<compile_context>
chip_gen: v7x
topology: tpu7x:2x2x1
jax: 0.10.0
libtpu: 0.0.40
codegen_flags: <defaults>
</compile_context>

<pallas_src>
import functools

import jax
import jax.numpy as jnp
from jax.experimental import pallas as pl
from jax.experimental.pallas import tpu as pltpu

F = 128  # lane-padded feature width for every layer
# encoder: Linear+ReLU, Linear+ReLU, Linear+ReLU, Linear
# decoder: Linear+ReLU, Linear+ReLU, Linear+ReLU, Linear
RELU_LAYERS = (True, True, True, False, True, True, True, False)


def _round_up(n: int, m: int) -> int:
    return ((n + m - 1) // m) * m


def autoencoder_kernel(x_ref, w_ref, b_ref, o_ref):
    """Push one batch tile through all 8 layers.

    x_ref: [TB, 128] f32        (features zero-padded to 128 lanes)
    w_ref: [8, 128, 128] bf16   (resident weight slab, [in, out] per layer)
    b_ref: [8, 128] f32         (resident bias slab)
    o_ref: [TB, 128] f32
    """
    h = x_ref[...]               # f32 activations, live in vregs
    biases = b_ref[...]          # 4 KiB -> load once, slice in-register

    # Static Python loop -> fully unrolled trace; all weight slices are static.
    for layer, relu in enumerate(RELU_LAYERS):
        w = w_ref[layer]                                   # [128,128] bf16
        y = jnp.dot(h.astype(jnp.bfloat16), w,
                    preferred_element_type=jnp.float32)    # MXU, f32 accum
        y = y + biases[layer][None, :]                     # f32 VPU epilogue
        h = jnp.maximum(y, 0.0) if relu else y

    o_ref[...] = h.astype(o_ref.dtype)


def init_params(key, input_size: int, inner_size: int = 12):
    """PyTorch nn.Linear-style uniform(+/- 1/sqrt(fan_in)) init.

    Returns a flat list [w1, b1, ..., w8, b8]; weights stored as [in, out]
    (transposed relative to nn.Linear.weight), biases as [out].
    """
    dims = [input_size, 128, 64, 32, inner_size, 32, 64, 128, input_size]
    params = []
    for i in range(len(dims) - 1):
        fan_in, fan_out = dims[i], dims[i + 1]
        key, kw, kb = jax.random.split(key, 3)
        bound = 1.0 / (fan_in ** 0.5)
        w = jax.random.uniform(kw, (fan_in, fan_out), jnp.float32,
                               minval=-bound, maxval=bound)
        b = jax.random.uniform(kb, (fan_out,), jnp.float32,
                               minval=-bound, maxval=bound)
        params += [w, b]
    return params


def pack_params(params):
    """Zero-pad every layer to 128x128 and pack into two contiguous slabs."""
    w_slab = jnp.zeros((8, F, F), jnp.float32)
    b_slab = jnp.zeros((8, F), jnp.float32)
    for layer in range(8):
        w, b = params[2 * layer], params[2 * layer + 1]
        fan_in, fan_out = w.shape
        assert fan_in <= F and fan_out <= F, "layer wider than 128 not packed"
        w_slab = w_slab.at[layer, :fan_in, :fan_out].set(w)
        b_slab = b_slab.at[layer, :fan_out].set(b)
    # bf16 weights for the MXU fast path; biases stay f32 for the epilogue.
    return w_slab.astype(jnp.bfloat16), b_slab


@functools.partial(jax.jit, static_argnames=("block_batch",))
def autoencoder_forward(x, w_slab, b_slab, *, block_batch: int = 256):
    batch, input_size = x.shape
    assert input_size <= F, "this packed-slab kernel assumes input_size <= 128"
    # TODO(synk): input_size > 128 would need a wider first/last layer slab.

    # Batch tile: big (amortizes ~0.35us per grid step), multiple of 16 so the
    # in-register bf16 cast stays on whole packed sublane pairs.
    tb = min(block_batch, _round_up(batch, 16))
    padded_batch = _round_up(batch, tb)
    grid = (padded_batch // tb,)

    # Zero-pad features to 128 lanes and batch to a multiple of the tile.
    xp = jnp.pad(x, ((0, padded_batch - batch), (0, F - input_size)))

    out_padded = pl.pallas_call(
        autoencoder_kernel,
        out_shape=jax.ShapeDtypeStruct((padded_batch, F), x.dtype),
        grid=grid,
        in_specs=[
            pl.BlockSpec((tb, F), lambda i: (i, 0)),        # streamed batch tile
            pl.BlockSpec((8, F, F), lambda i: (0, 0, 0)),   # resident weights
            pl.BlockSpec((8, F), lambda i: (0, 0)),         # resident biases
        ],
        out_specs=pl.BlockSpec((tb, F), lambda i: (i, 0)),
        compiler_params=pltpu.CompilerParams(
            dimension_semantics=("parallel",),              # 2 TCs on v7x
            vmem_limit_bytes=32 * 1024 * 1024,              # fits v7x's 64 MiB
        ),
    )(xp, w_slab, b_slab)

    return out_padded[:batch, :input_size]


def reference_forward(x, w_slab, b_slab):
    """Pure-JAX reference doing the exact same math (bf16 matmul, f32 accum)."""
    batch, input_size = x.shape
    h = jnp.pad(x, ((0, 0), (0, F - input_size)))
    for layer, relu in enumerate(RELU_LAYERS):
        h = jnp.dot(h.astype(jnp.bfloat16), w_slab[layer],
                    preferred_element_type=jnp.float32) + b_slab[layer]
        if relu:
            h = jnp.maximum(h, 0.0)
    return h[:, :input_size].astype(x.dtype)


if __name__ == "__main__":
    key = jax.random.PRNGKey(0)
    k_x, k_p = jax.random.split(key)

    batch = 200          # deliberately not a multiple of the tile (tests padding)
    input_size = 64
    inner_size = 12

    x = jax.random.normal(k_x, (batch, input_size), jnp.float32)
    params = init_params(k_p, input_size, inner_size)
    w_slab, b_slab = pack_params(params)

    out = autoencoder_forward(x, w_slab, b_slab)
    jax.block_until_ready(out)

    ref = reference_forward(x, w_slab, b_slab)
    assert out.shape == (batch, input_size), out.shape
    assert jnp.allclose(out, ref, atol=2e-3, rtol=2e-3), \
        float(jnp.max(jnp.abs(out - ref)))

    print("KERNEL_OK")
</pallas_src>

<mosaic_0001>
module attributes {stable_mosaic.version = 11 : i64} {
  func.func @autoencoder_kernel(%arg0: i32, %arg1: memref<208x128xf32, #tpu.memory_space<vmem>>, %arg2: memref<8x128x128xbf16, #tpu.memory_space<vmem>>, %arg3: memref<8x128xf32, #tpu.memory_space<vmem>>, %arg4: memref<208x128xf32, #tpu.memory_space<vmem>>) attributes {dimension_semantics = [#tpu.dimension_semantics<parallel>], iteration_bounds = array<i64: 1>, scalar_prefetch = 0 : i64, scratch_operands = 0 : i64, tpu.core_type = #tpu.core_type<tc>, window_params = [{transform_indices = @transform_0, window_bounds = array<i64: 208, 128>}, {pipeline_mode = #tpu.pipeline_mode<synchronous>, transform_indices = @transform_1, window_bounds = array<i64: 8, 128, 128>}, {pipeline_mode = #tpu.pipeline_mode<synchronous>, transform_indices = @transform_2, window_bounds = array<i64: 8, 128>}, {transform_indices = @transform_3, window_bounds = array<i64: 208, 128>}]} {
    %c0 = arith.constant 0 : index
    %c0_0 = arith.constant 0 : index
    %0 = vector.load %arg1[%c0, %c0_0] : memref<208x128xf32, #tpu.memory_space<vmem>>, vector<208x128xf32>
    %c0_1 = arith.constant 0 : index
    %c0_2 = arith.constant 0 : index
    %1 = vector.load %arg3[%c0_1, %c0_2] : memref<8x128xf32, #tpu.memory_space<vmem>>, vector<8x128xf32>
    %c0_3 = arith.constant 0 : index
    %c0_4 = arith.constant 0 : index
    %c0_5 = arith.constant 0 : index
    %2 = vector.load %arg2[%c0_3, %c0_4, %c0_5] : memref<8x128x128xbf16, #tpu.memory_space<vmem>>, vector<1x128x128xbf16>
    %3 = vector.shape_cast %2 : vector<1x128x128xbf16> to vector<128x128xbf16>
    %4 = arith.truncf %0 : vector<208x128xf32> to vector<208x128xbf16>
    %cst = arith.constant dense<0.000000e+00> : vector<208x128xf32>
    %5 = tpu.matmul %4, %3, %cst {dimension_numbers = #tpu.dot_dimension_numbers<[1], [0], [0], [1], [0, 0, 1, 1], [], []>} : vector<208x128xbf16>, vector<128x128xbf16>, vector<208x128xf32> -> vector<208x128xf32>
    %6 = vector.extract_strided_slice %1 {offsets = [0, 0], sizes = [1, 128], strides = [1, 1]} : vector<8x128xf32> to vector<1x128xf32>
    %7 = vector.shape_cast %6 : vector<1x128xf32> to vector<128xf32>
    %8 = vector.shape_cast %7 : vector<128xf32> to vector<1x128xf32>
    %9 = vector.broadcast %8 : vector<1x128xf32> to vector<208x128xf32>
    %10 = arith.addf %5, %9 : vector<208x128xf32>
    %cst_6 = arith.constant 0.000000e+00 : f32
    %11 = vector.broadcast %cst_6 : f32 to vector<208x128xf32>
    %12 = arith.maximumf %10, %11 : vector<208x128xf32>
    %c1 = arith.constant 1 : index
    %c0_7 = arith.constant 0 : index
    %c0_8 = arith.constant 0 : index
    %13 = vector.load %arg2[%c1, %c0_7, %c0_8] : memref<8x128x128xbf16, #tpu.memory_space<vmem>>, vector<1x128x128xbf16>
    %14 = vector.shape_cast %13 : vector<1x128x128xbf16> to vector<128x128xbf16>
    %15 = arith.truncf %12 : vector<208x128xf32> to vector<208x128xbf16>
    %cst_9 = arith.constant dense<0.000000e+00> : vector<208x128xf32>
    %16 = tpu.matmul %15, %14, %cst_9 {dimension_numbers = #tpu.dot_dimension_numbers<[1], [0], [0], [1], [0, 0, 1, 1], [], []>} : vector<208x128xbf16>, vector<128x128xbf16>, vector<208x128xf32> -> vector<208x128xf32>
    %17 = vector.extract_strided_slice %1 {offsets = [1, 0], sizes = [1, 128], strides = [1, 1]} : vector<8x128xf32> to vector<1x128xf32>
    %18 = vector.shape_cast %17 : vector<1x128xf32> to vector<128xf32>
    %19 = vector.shape_cast %18 : vector<128xf32> to vector<1x128xf32>
    %20 = vector.broadcast %19 : vector<1x128xf32> to vector<208x128xf32>
    %21 = arith.addf %16, %20 : vector<208x128xf32>
    %cst_10 = arith.constant 0.000000e+00 : f32
    %22 = vector.broadcast %cst_10 : f32 to vector<208x128xf32>
    %23 = arith.maximumf %21, %22 : vector<208x128xf32>
    %c2 = arith.constant 2 : index
    %c0_11 = arith.constant 0 : index
    %c0_12 = arith.constant 0 : index
    %24 = vector.load %arg2[%c2, %c0_11, %c0_12] : memref<8x128x128xbf16, #tpu.memory_space<vmem>>, vector<1x128x128xbf16>
    %25 = vector.shape_cast %24 : vector<1x128x128xbf16> to vector<128x128xbf16>
    %26 = arith.truncf %23 : vector<208x128xf32> to vector<208x128xbf16>
    %cst_13 = arith.constant dense<0.000000e+00> : vector<208x128xf32>
    %27 = tpu.matmul %26, %25, %cst_13 {dimension_numbers = #tpu.dot_dimension_numbers<[1], [0], [0], [1], [0, 0, 1, 1], [], []>} : vector<208x128xbf16>, vector<128x128xbf16>, vector<208x128xf32> -> vector<208x128xf32>
    %28 = vector.extract_strided_slice %1 {offsets = [2, 0], sizes = [1, 128], strides = [1, 1]} : vector<8x128xf32> to vector<1x128xf32>
    %29 = vector.shape_cast %28 : vector<1x128xf32> to vector<128xf32>
    %30 = vector.shape_cast %29 : vector<128xf32> to vector<1x128xf32>
    %31 = vector.broadcast %30 : vector<1x128xf32> to vector<208x128xf32>
    %32 = arith.addf %27, %31 : vector<208x128xf32>
    %cst_14 = arith.constant 0.000000e+00 : f32
    %33 = vector.broadcast %cst_14 : f32 to vector<208x128xf32>
    %34 = arith.maximumf %32, %33 : vector<208x128xf32>
    %c3 = arith.constant 3 : index
    %c0_15 = arith.constant 0 : index
    %c0_16 = arith.constant 0 : index
    %35 = vector.load %arg2[%c3, %c0_15, %c0_16] : memref<8x128x128xbf16, #tpu.memory_space<vmem>>, vector<1x128x128xbf16>
    %36 = vector.shape_cast %35 : vector<1x128x128xbf16> to vector<128x128xbf16>
    %37 = arith.truncf %34 : vector<208x128xf32> to vector<208x128xbf16>
    %cst_17 = arith.constant dense<0.000000e+00> : vector<208x128xf32>
    %38 = tpu.matmul %37, %36, %cst_17 {dimension_numbers = #tpu.dot_dimension_numbers<[1], [0], [0], [1], [0, 0, 1, 1], [], []>} : vector<208x128xbf16>, vector<128x128xbf16>, vector<208x128xf32> -> vector<208x128xf32>
    %39 = vector.extract_strided_slice %1 {offsets = [3, 0], sizes = [1, 128], strides = [1, 1]} : vector<8x128xf32> to vector<1x128xf32>
    %40 = vector.shape_cast %39 : vector<1x128xf32> to vector<128xf32>
    %41 = vector.shape_cast %40 : vector<128xf32> to vector<1x128xf32>
    %42 = vector.broadcast %41 : vector<1x128xf32> to vector<208x128xf32>
    %43 = arith.addf %38, %42 : vector<208x128xf32>
    %c4 = arith.constant 4 : index
    %c0_18 = arith.constant 0 : index
    %c0_19 = arith.constant 0 : index
    %44 = vector.load %arg2[%c4, %c0_18, %c0_19] : memref<8x128x128xbf16, #tpu.memory_space<vmem>>, vector<1x128x128xbf16>
    %45 = vector.shape_cast %44 : vector<1x128x128xbf16> to vector<128x128xbf16>
    %46 = arith.truncf %43 : vector<208x128xf32> to vector<208x128xbf16>
    %cst_20 = arith.constant dense<0.000000e+00> : vector<208x128xf32>
    %47 = tpu.matmul %46, %45, %cst_20 {dimension_numbers = #tpu.dot_dimension_numbers<[1], [0], [0], [1], [0, 0, 1, 1], [], []>} : vector<208x128xbf16>, vector<128x128xbf16>, vector<208x128xf32> -> vector<208x128xf32>
    %48 = vector.extract_strided_slice %1 {offsets = [4, 0], sizes = [1, 128], strides = [1, 1]} : vector<8x128xf32> to vector<1x128xf32>
    %49 = vector.shape_cast %48 : vector<1x128xf32> to vector<128xf32>
    %50 = vector.shape_cast %49 : vector<128xf32> to vector<1x128xf32>
    %51 = vector.broadcast %50 : vector<1x128xf32> to vector<208x128xf32>
    %52 = arith.addf %47, %51 : vector<208x128xf32>
    %cst_21 = arith.constant 0.000000e+00 : f32
    %53 = vector.broadcast %cst_21 : f32 to vector<208x128xf32>
    %54 = arith.maximumf %52, %53 : vector<208x128xf32>
    %c5 = arith.constant 5 : index
    %c0_22 = arith.constant 0 : index
    %c0_23 = arith.constant 0 : index
    %55 = vector.load %arg2[%c5, %c0_22, %c0_23] : memref<8x128x128xbf16, #tpu.memory_space<vmem>>, vector<1x128x128xbf16>
    %56 = vector.shape_cast %55 : vector<1x128x128xbf16> to vector<128x128xbf16>
    %57 = arith.truncf %54 : vector<208x128xf32> to vector<208x128xbf16>
    %cst_24 = arith.constant dense<0.000000e+00> : vector<208x128xf32>
    %58 = tpu.matmul %57, %56, %cst_24 {dimension_numbers = #tpu.dot_dimension_numbers<[1], [0], [0], [1], [0, 0, 1, 1], [], []>} : vector<208x128xbf16>, vector<128x128xbf16>, vector<208x128xf32> -> vector<208x128xf32>
    %59 = vector.extract_strided_slice %1 {offsets = [5, 0], sizes = [1, 128], strides = [1, 1]} : vector<8x128xf32> to vector<1x128xf32>
    %60 = vector.shape_cast %59 : vector<1x128xf32> to vector<128xf32>
    %61 = vector.shape_cast %60 : vector<128xf32> to vector<1x128xf32>
    %62 = vector.broadcast %61 : vector<1x128xf32> to vector<208x128xf32>
    %63 = arith.addf %58, %62 : vector<208x128xf32>
    %cst_25 = arith.constant 0.000000e+00 : f32
    %64 = vector.broadcast %cst_25 : f32 to vector<208x128xf32>
    %65 = arith.maximumf %63, %64 : vector<208x128xf32>
    %c6 = arith.constant 6 : index
    %c0_26 = arith.constant 0 : index
    %c0_27 = arith.constant 0 : index
    %66 = vector.load %arg2[%c6, %c0_26, %c0_27] : memref<8x128x128xbf16, #tpu.memory_space<vmem>>, vector<1x128x128xbf16>
    %67 = vector.shape_cast %66 : vector<1x128x128xbf16> to vector<128x128xbf16>
    %68 = arith.truncf %65 : vector<208x128xf32> to vector<208x128xbf16>
    %cst_28 = arith.constant dense<0.000000e+00> : vector<208x128xf32>
    %69 = tpu.matmul %68, %67, %cst_28 {dimension_numbers = #tpu.dot_dimension_numbers<[1], [0], [0], [1], [0, 0, 1, 1], [], []>} : vector<208x128xbf16>, vector<128x128xbf16>, vector<208x128xf32> -> vector<208x128xf32>
    %70 = vector.extract_strided_slice %1 {offsets = [6, 0], sizes = [1, 128], strides = [1, 1]} : vector<8x128xf32> to vector<1x128xf32>
    %71 = vector.shape_cast %70 : vector<1x128xf32> to vector<128xf32>
    %72 = vector.shape_cast %71 : vector<128xf32> to vector<1x128xf32>
    %73 = vector.broadcast %72 : vector<1x128xf32> to vector<208x128xf32>
    %74 = arith.addf %69, %73 : vector<208x128xf32>
    %cst_29 = arith.constant 0.000000e+00 : f32
    %75 = vector.broadcast %cst_29 : f32 to vector<208x128xf32>
    %76 = arith.maximumf %74, %75 : vector<208x128xf32>
    %c7 = arith.constant 7 : index
    %c0_30 = arith.constant 0 : index
    %c0_31 = arith.constant 0 : index
    %77 = vector.load %arg2[%c7, %c0_30, %c0_31] : memref<8x128x128xbf16, #tpu.memory_space<vmem>>, vector<1x128x128xbf16>
    %78 = vector.shape_cast %77 : vector<1x128x128xbf16> to vector<128x128xbf16>
    %79 = arith.truncf %76 : vector<208x128xf32> to vector<208x128xbf16>
    %cst_32 = arith.constant dense<0.000000e+00> : vector<208x128xf32>
    %80 = tpu.matmul %79, %78, %cst_32 {dimension_numbers = #tpu.dot_dimension_numbers<[1], [0], [0], [1], [0, 0, 1, 1], [], []>} : vector<208x128xbf16>, vector<128x128xbf16>, vector<208x128xf32> -> vector<208x128xf32>
    %81 = vector.extract_strided_slice %1 {offsets = [7, 0], sizes = [1, 128], strides = [1, 1]} : vector<8x128xf32> to vector<1x128xf32>
    %82 = vector.shape_cast %81 : vector<1x128xf32> to vector<128xf32>
    %83 = vector.shape_cast %82 : vector<128xf32> to vector<1x128xf32>
    %84 = vector.broadcast %83 : vector<1x128xf32> to vector<208x128xf32>
    %85 = arith.addf %80, %84 : vector<208x128xf32>
    %c0_33 = arith.constant 0 : index
    %c0_34 = arith.constant 0 : index
    %86 = vector.load %arg4[%c0_33, %c0_34] : memref<208x128xf32, #tpu.memory_space<vmem>>, vector<208x128xf32>
    tpu.vector_store %arg4[%c0_33, %c0_34], %85 {strides = array<i32>} : memref<208x128xf32, #tpu.memory_space<vmem>>, vector<208x128xf32>,
    return
  }
  func.func @transform_0(%arg0: i32) -> (i32, i32) {
    %c0_i32 = arith.constant 0 : i32
    %c0_i32_0 = arith.constant 0 : i32
    return %arg0, %c0_i32 : i32, i32
  }
  func.func @transform_1(%arg0: i32) -> (i32, i32, i32) {
    %c0_i32 = arith.constant 0 : i32
    %c0_i32_0 = arith.constant 0 : i32
    %c0_i32_1 = arith.constant 0 : i32
    %c0_i32_2 = arith.constant 0 : i32
    return %c0_i32, %c0_i32_0, %c0_i32_1 : i32, i32, i32
  }
  func.func @transform_2(%arg0: i32) -> (i32, i32) {
    %c0_i32 = arith.constant 0 : i32
    %c0_i32_0 = arith.constant 0 : i32
    %c0_i32_1 = arith.constant 0 : i32
    return %c0_i32, %c0_i32_0 : i32, i32
  }
  func.func @transform_3(%arg0: i32) -> (i32, i32) {
    %c0_i32 = arith.constant 0 : i32
    %c0_i32_0 = arith.constant 0 : i32
    return %arg0, %c0_i32 : i32, i32
  }
}

</mosaic_0001>

<bundles_post_ra>
// kernel: autoencoder_forward.1
= control target key start
LH: loop header
LB: loop body
LE: loop exit
PB: predicated region body
PF: predicated region fallthrough
CT: control target
= control target key end

     0   :  { %v2935_v0 = vmov 0.0   ;;  %vm2936_vm0 = vmmov 0   ;;  %v71_v59 = vlaneseq  ;;  %s3831_s1 = inlined_call_operand.vmem [shape: bf16[8,128,128], index: 1, kind: input, shape index: {}]   ;;  %s3832_s0 = inlined_call_operand.vmem [shape: f32[208,128], index: 0, kind: input, shape index: {}]   ;;  %s3833_s2 = inlined_call_operand.vmem [shape: f32[8,128], index: 2, kind: input, shape index: {}]   ;;  %s3834_s3 = inlined_call_operand.vmem [shape: f32[208,128], index: 3, kind: output, shape index: {}]  }
   0x1   :  { %2323 = vmatprep.subr.bf16.mxu0 %v2935_v0  ;;  %v2869_v1 = vld [vmem:[%s3831_s1] sm:$0xff]   ;;  %2339 = vmatprep.mubr.msk.bf16.mxu0 %vm2936_vm0, %v2935_v0  ;;  %v2870_v2 = vld [vmem:[%s3831_s1 + $0x8] sm:$0xff]   ;;  %v2871_v3 = vld [vmem:[%s3831_s1 + $0x10] sm:$0xff]  }
   0x2   :  { %2391 = vmatprep.subr.bf16.mxu1 %v2935_v0  ;;  %2407 = vmatprep.mubr.msk.bf16.mxu1 %vm2936_vm0, %v2935_v0  ;;  %v2872_v4 = vld [vmem:[%s3831_s1 + $0x18] sm:$0xff]   ;;  %v2873_v5 = vld [vmem:[%s3831_s1 + $0x20] sm:$0xff]   ;;  %v2874_v7 = vld [vmem:[%s3831_s1 + $0x28] sm:$0xff]   ;;  %v3146_v61 = vshrl.u32 %v71_v59, 7 }
   0x3   :  { %2324 = vmatpush3.bf16.msra.mxu0 %v2869_v1  ;;  %v2877_v6 = vld [vmem:[%s3831_s1 + $0x40] sm:$0xff]   ;;  %v2878_v8 = vld [vmem:[%s3831_s1 + $0x48] sm:$0xff]   ;;  %v2875_v9 = vld [vmem:[%s3831_s1 + $0x30] sm:$0xff]  }
   0x4   :  { %2325 = vmatprep.subr.bf16.mxu0 %v2935_v0  ;;  %2392 = vmatpush3.bf16.msra.mxu1 %v2877_v6  ;;  %v2879_v10 = vld [vmem:[%s3831_s1 + $0x50] sm:$0xff]   ;;  %v2876_v11 = vld [vmem:[%s3831_s1 + $0x38] sm:$0xff]   ;;  %v15_v12 = vld [vmem:[%s3832_s0] sm:$0xff]  ;;  %v73_v63 = vsub.s32 0, %v3146_v61 }
   0x5   :  { %2393 = vmatprep.subr.bf16.mxu1 %v2935_v0  ;;  %v16_v13 = vld [vmem:[%s3832_s0 + $0x8] sm:$0xff]  ;;  %v2880_v14 = vld [vmem:[%s3831_s1 + $0x58] sm:$0xff]   ;;  %v2881_v16 = vld [vmem:[%s3831_s1 + $0x60] sm:$0xff]  }
   0x6   :  { %v58_v15 = vpack.c.bf16 %v16_v13, %v15_v12  ;;  %v17_v17 = vld [vmem:[%s3832_s0 + $0x10] sm:$0xff]  ;;  %v18_v18 = vld [vmem:[%s3832_s0 + $0x18] sm:$0xff]  ;;  %v2882_v19 = vld [vmem:[%s3831_s1 + $0x68] sm:$0xff]  }
   0x7   :  { %2326 = vmatpush3.bf16.msra.mxu0 %v2870_v2  ;;  %v59_v20 = vpack.c.bf16 %v18_v18, %v17_v17  ;;  %v19_v21 = vld [vmem:[%s3832_s0 + $0x20] sm:$0xff]  ;;  %v20_v22 = vld [vmem:[%s3832_s0 + $0x28] sm:$0xff]  ;;  %v21_v24 = vld [vmem:[%s3832_s0 + $0x30] sm:$0xff] }
   0x8   :  { %2327 = vmatprep.subr.bf16.mxu0 %v2935_v0  ;;  %2394 = vmatpush3.bf16.msra.mxu1 %v2878_v8  ;;  %v60_v23 = vpack.c.bf16 %v20_v22, %v19_v21  ;;  %v22_v25 = vld [vmem:[%s3832_s0 + $0x38] sm:$0xff]  ;;  %v23_v27 = vld [vmem:[%s3832_s0 + $0x40] sm:$0xff]  ;;  %v24_v28 = vld [vmem:[%s3832_s0 + $0x48] sm:$0xff] }
   0x9   :  { %2395 = vmatprep.subr.bf16.mxu1 %v2935_v0  ;;  %v61_v26 = vpack.c.bf16 %v22_v25, %v21_v24  ;;  %v62_v29 = vpack.c.bf16 %v24_v28, %v23_v27  ;;  %v25_v30 = vld [vmem:[%s3832_s0 + $0x50] sm:$0xff]  ;;  %v26_v31 = vld [vmem:[%s3832_s0 + $0x58] sm:$0xff]  ;;  %v27_v33 = vld [vmem:[%s3832_s0 + $0x60] sm:$0xff] }
   0xa   :  { %v63_v32 = vpack.c.bf16 %v26_v31, %v25_v30  ;;  %v28_v34 = vld [vmem:[%s3832_s0 + $0x68] sm:$0xff]  ;;  %v29_v36 = vld [vmem:[%s3832_s0 + $0x70] sm:$0xff]  ;;  %v30_v37 = vld [vmem:[%s3832_s0 + $0x78] sm:$0xff] }
   0xb   :  { %2328 = vmatpush3.bf16.msra.mxu0 %v2871_v3  ;;  %v64_v35 = vpack.c.bf16 %v28_v34, %v27_v33  ;;  %v65_v38 = vpack.c.bf16 %v30_v37, %v29_v36  ;;  %v31_v39 = vld [vmem:[%s3832_s0 + $0x80] sm:$0xff]  ;;  %v32_v40 = vld [vmem:[%s3832_s0 + $0x88] sm:$0xff]  ;;  %v33_v42 = vld [vmem:[%s3832_s0 + $0x90] sm:$0xff] }
   0xc   :  { %2329 = vmatprep.subr.bf16.mxu0 %v2935_v0  ;;  %2396 = vmatpush3.bf16.msra.mxu1 %v2879_v10  ;;  %v66_v41 = vpack.c.bf16 %v32_v40, %v31_v39  ;;  %v34_v43 = vld [vmem:[%s3832_s0 + $0x98] sm:$0xff]  ;;  %v35_v45 = vld [vmem:[%s3832_s0 + $0xa0] sm:$0xff]  ;;  %v36_v46 = vld [vmem:[%s3832_s0 + $0xa8] sm:$0xff] }
   0xd   :  { %2397 = vmatprep.subr.bf16.mxu1 %v2935_v0  ;;  %v67_v44 = vpack.c.bf16 %v34_v43, %v33_v42  ;;  %v68_v47 = vpack.c.bf16 %v36_v46, %v35_v45  ;;  %v37_v48 = vld [vmem:[%s3832_s0 + $0xb0] sm:$0xff]  ;;  %v38_v49 = vld [vmem:[%s3832_s0 + $0xb8] sm:$0xff]  ;;  %v39_v53 = vld [vmem:[%s3832_s0 + $0xc0] sm:$0xff] }
   0xe   :  { %v2883_v50 = vld [vmem:[%s3831_s1 + $0x70] sm:$0xff]   ;;  %v69_v51 = vpack.c.bf16 %v38_v49, %v37_v48  ;;  %v2884_v52 = vld [vmem:[%s3831_s1 + $0x78] sm:$0xff]   ;;  %v40_v54 = vld [vmem:[%s3832_s0 + $0xc8] sm:$0xff] }
   0xf   :  { %2330 = vmatpush3.bf16.msra.mxu0 %v2872_v4  ;;  %v70_v55 = vpack.c.bf16 %v40_v54, %v39_v53  ;;  %v2885_v56 = vld [vmem:[%s3831_s1 + $0x80] sm:$0xff]   ;;  %v2886_v57 = vld [vmem:[%s3831_s1 + $0x88] sm:$0xff]   ;;  %v2887_v58 = vld [vmem:[%s3831_s1 + $0x90] sm:$0xff]  }
  0x10   :  { %2331 = vmatprep.subr.bf16.mxu0 %v2935_v0  ;;  %2398 = vmatpush3.bf16.msra.mxu1 %v2880_v14  ;;  %v2888_v60 = vld [vmem:[%s3831_s1 + $0x98] sm:$0xff]   ;;  %v2889_v62 = vld [vmem:[%s3831_s1 + $0xa0] sm:$0xff]   ;;  %v2890_v2 = vld [vmem:[%s3831_s1 + $0xa8] sm:$0xff]  }
  0x11   :  { %2399 = vmatprep.subr.bf16.mxu1 %v2935_v0  ;;  %v3156_v1 = vld [vmem:[%s3833_s2] sm:$0xff]  ;;  %v2891_v4 = vld [vmem:[%s3831_s1 + $0xb0] sm:$0xff]  }
  0x12   :  { %v3163_v3 = vrot.slane %v3156_v1, %v73_v63 }
  0x13   :  { %2332 = vmatpush3.bf16.msra.mxu0 %v2873_v5 }
  0x14   :  { %2333 = vmatprep.subr.bf16.mxu0 %v2935_v0  ;;  %2400 = vmatpush3.bf16.msra.mxu1 %v2881_v16 }
  0x15   :  { %2401 = vmatprep.subr.bf16.mxu1 %v2935_v0 }
  0x17   :  { %2334 = vmatpush3.bf16.msra.mxu0 %v2874_v7 }
  0x18   :  { %2335 = vmatprep.subr.bf16.mxu0 %v2935_v0  ;;  %2402 = vmatpush3.bf16.msra.mxu1 %v2882_v19 }
  0x19   :  { %2403 = vmatprep.subr.bf16.mxu1 %v2935_v0 }
  0x1b   :  { %2336 = vmatpush3.bf16.msra.mxu0 %v2875_v9 }
  0x1c   :  { %2337 = vmatprep.subr.bf16.mxu0 %v2935_v0  ;;  %2404 = vmatpush3.bf16.msra.mxu1 %v2883_v50 }
  0x1d   :  { %2405 = vmatprep.subr.bf16.mxu1 %v2935_v0 }
  0x1f   :  { %2338 = vmatpush3.bf16.msra.mxu0 %v2876_v11  ;;  %v2892_v11 = vld [vmem:[%s3831_s1 + $0xb8] sm:$0xff]  }
  0x20   :  { %2459 = vmatprep.subr.bf16.mxu0 %v2935_v0  ;;  %2406 = vmatpush3.bf16.msra.mxu1 %v2884_v52 }
  0x21   :  { %2527 = vmatprep.subr.bf16.mxu1 %v2935_v0 }
  0x22   :  { %2340 = vmatmul.mubr.bf16.vlgmr.msra.gmra.mrb[0].mxu0 %v58_v15 }
  0x23   :  { %2343 = vmatprep.mubr.msk.bf16.mxu0 %vm2936_vm0, %v2935_v0  ;;  %2460 = vmatpush3.bf16.msra.mxu0 %v2885_v56 }
  0x24   :  { %2461 = vmatprep.subr.bf16.mxu0 %v2935_v0 }
  0x27   :  { %2462 = vmatpush3.bf16.msra.mxu0 %v2886_v57 }
  0x28   :  { %2463 = vmatprep.subr.bf16.mxu0 %v2935_v0 }
  0x2a   :  { %2344 = vmatmul.mubr.bf16.gmra.mrb[4].mxu0 %v59_v20 }
  0x2b   :  { %2347 = vmatprep.mubr.msk.bf16.mxu0 %vm2936_vm0, %v2935_v0  ;;  %2464 = vmatpush3.bf16.msra.mxu0 %v2887_v58 }
  0x2c   :  { %2465 = vmatprep.subr.bf16.mxu0 %v2935_v0 }
  0x2f   :  { %2466 = vmatpush3.bf16.msra.mxu0 %v2888_v60 }
  0x30   :  { %2467 = vmatprep.subr.bf16.mxu0 %v2935_v0 }
  0x32   :  { %2348 = vmatmul.mubr.bf16.gmra.mrb[8].mxu0 %v60_v23 }
  0x33   :  { %2351 = vmatprep.mubr.msk.bf16.mxu0 %vm2936_vm0, %v2935_v0  ;;  %2468 = vmatpush3.bf16.msra.mxu0 %v2889_v62 }
  0x34   :  { %2469 = vmatprep.subr.bf16.mxu0 %v2935_v0 }
  0x37   :  { %2470 = vmatpush3.bf16.msra.mxu0 %v2890_v2 }
  0x38   :  { %2471 = vmatprep.subr.bf16.mxu0 %v2935_v0 }
  0x3a   :  { %2352 = vmatmul.mubr.bf16.gmra.mrb[12].mxu0 %v61_v26 }
  0x3b   :  { %2355 = vmatprep.mubr.msk.bf16.mxu0 %vm2936_vm0, %v2935_v0  ;;  %2472 = vmatpush3.bf16.msra.mxu0 %v2891_v4 }
  0x3c   :  { %2473 = vmatprep.subr.bf16.mxu0 %v2935_v0 }
  0x3f   :  { %2474 = vmatpush3.bf16.msra.mxu0 %v2892_v11 }
  0x40   :  { %2595 = vmatprep.subr.bf16.mxu0 %v2935_v0 }
  0x42   :  { %2356 = vmatmul.mubr.bf16.gmra.mrb[16].mxu0 %v62_v29 }
  0x43   :  { %2359 = vmatprep.mubr.msk.bf16.mxu0 %vm2936_vm0, %v2935_v0 }
  0x4a   :  { %2360 = vmatmul.mubr.bf16.gmra.mrb[20].mxu0 %v63_v32 }
  0x4b   :  { %2363 = vmatprep.mubr.msk.bf16.mxu0 %vm2936_vm0, %v2935_v0 }
  0x52   :  { %2364 = vmatmul.mubr.bf16.gmra.mrb[24].mxu0 %v64_v35 }
  0x53   :  { %2367 = vmatprep.mubr.msk.bf16.mxu0 %vm2936_vm0, %v2935_v0 }
  0x5a   :  { %2368 = vmatmul.mubr.bf16.gmra.mrb[28].mxu0 %v65_v38 }
  0x5b   :  { %2371 = vmatprep.mubr.msk.bf16.mxu0 %vm2936_vm0, %v2935_v0 }
  0x62   :  { %2372 = vmatmul.mubr.bf16.gmra.mrb[32].mxu0 %v66_v41 }
  0x63   :  { %2375 = vmatprep.mubr.msk.bf16.mxu0 %vm2936_vm0, %v2935_v0 }
  0x6a   :  { %2376 = vmatmul.mubr.bf16.gmra.mrb[36].mxu0 %v67_v44 }
  0x6b   :  { %2379 = vmatprep.mubr.msk.bf16.mxu0 %vm2936_vm0, %v2935_v0 }
  0x72   :  { %2380 = vmatmul.mubr.bf16.gmra.mrb[40].mxu0 %v68_v47 }
  0x73   :  { %2383 = vmatprep.mubr.msk.bf16.mxu0 %vm2936_vm0, %v2935_v0 }
  0x7a   :  { %2384 = vmatmul.mubr.bf16.gmra.mrb[44].mxu0 %v69_v51 }
  0x7b   :  { %2387 = vmatprep.mubr.msk.bf16.mxu0 %vm2936_vm0, %v2935_v0 }
  0x82   :  { %2388 = vmatmul.mubr.bf16.gmra.mrb[48].mxu0 %v70_v55 }
  0x83   :  { %2475 = vmatprep.mubr.msk.bf16.mxu0 %vm2936_vm0, %v2935_v0 }
  0xf5   :  { %v157_v5 = vpop.f32.mrb[0].mxu0 }
  0xf6   :  { %v158_v6 = vadd.f32 %v157_v5, %v3163_v3  ;;  %v2341_v7 = vpop.f32.mrb[1].mxu0 }
  0xf7   :  { %v160_v8 = vpop.f32.mrb[2].mxu0 }
  0xf8   :  { %v161_v9 = vadd.f32 %v160_v8, %v3163_v3  ;;  %v2342_v10 = vpop.f32.mrb[3].mxu0  ;;  %v260_v12 = vmax.f32 %v158_v6, 0.0 }
  0xfa   :  { %v261_v13 = vmax.f32 %v161_v9, 0.0 }
  0xfc   :  { %v303_v14 = vpack.c.bf16 %v261_v13, %v260_v12 }
  0xfd   :  { %v165_v15 = vpop.f32.mrb[4].mxu0 }
  0xfe   :  { %v166_v16 = vadd.f32 %v165_v15, %v3163_v3  ;;  %v2345_v17 = vpop.f32.mrb[5].mxu0  ;;  %2408 = vmatmul.mubr.bf16.vlgmr.msra.gmra.mrb[0].mxu1 %v303_v14 }
  0xff   :  { %v168_v18 = vpop.f32.mrb[6].mxu0  ;;  %2411 = vmatprep.mubr.msk.bf16.mxu1 %vm2936_vm0, %v2935_v0 }
 0x100   :  { %v169_v19 = vadd.f32 %v168_v18, %v3163_v3  ;;  %v2346_v20 = vpop.f32.mrb[7].mxu0  ;;  %v262_v21 = vmax.f32 %v166_v16, 0.0 }
 0x102   :  { %v263_v22 = vmax.f32 %v169_v19, 0.0 }
 0x104   :  { %v304_v23 = vpack.c.bf16 %v263_v22, %v262_v21 }
 0x105   :  { %v173_v24 = vpop.f32.mrb[8].mxu0 }
 0x106   :  { %v174_v25 = vadd.f32 %v173_v24, %v3163_v3  ;;  %v2349_v26 = vpop.f32.mrb[9].mxu0  ;;  %2412 = vmatmul.mubr.bf16.gmra.mrb[4].mxu1 %v304_v23 }
 0x107   :  { %v176_v27 = vpop.f32.mrb[10].mxu0  ;;  %2415 = vmatprep.mubr.msk.bf16.mxu1 %vm2936_vm0, %v2935_v0 }
 0x108   :  { %v177_v28 = vadd.f32 %v176_v27, %v3163_v3  ;;  %v2350_v29 = vpop.f32.mrb[11].mxu0  ;;  %v264_v30 = vmax.f32 %v174_v25, 0.0 }
 0x10a   :  { %v265_v31 = vmax.f32 %v177_v28, 0.0 }
 0x10c   :  { %v305_v32 = vpack.c.bf16 %v265_v31, %v264_v30 }
 0x10d   :  { %v181_v33 = vpop.f32.mrb[12].mxu0 }
 0x10e   :  { %v182_v34 = vadd.f32 %v181_v33, %v3163_v3  ;;  %v2353_v35 = vpop.f32.mrb[13].mxu0  ;;  %2416 = vmatmul.mubr.bf16.gmra.mrb[8].mxu1 %v305_v32 }
 0x10f   :  { %v184_v36 = vpop.f32.mrb[14].mxu0  ;;  %2419 = vmatprep.mubr.msk.bf16.mxu1 %vm2936_vm0, %v2935_v0 }
 0x110   :  { %v185_v37 = vadd.f32 %v184_v36, %v3163_v3  ;;  %v2354_v38 = vpop.f32.mrb[15].mxu0  ;;  %v266_v39 = vmax.f32 %v182_v34, 0.0 }
 0x112   :  { %v267_v40 = vmax.f32 %v185_v37, 0.0 }
 0x114   :  { %v306_v41 = vpack.c.bf16 %v267_v40, %v266_v39 }
 0x115   :  { %v189_v42 = vpop.f32.mrb[16].mxu0 }
 0x116   :  { %v190_v43 = vadd.f32 %v189_v42, %v3163_v3  ;;  %v2357_v44 = vpop.f32.mrb[17].mxu0  ;;  %2420 = vmatmul.mubr.bf16.gmra.mrb[12].mxu1 %v306_v41 }
 0x117   :  { %v192_v45 = vpop.f32.mrb[18].mxu0  ;;  %2423 = vmatprep.mubr.msk.bf16.mxu1 %vm2936_vm0, %v2935_v0 }
 0x118   :  { %v193_v46 = vadd.f32 %v192_v45, %v3163_v3  ;;  %v2358_v47 = vpop.f32.mrb[19].mxu0  ;;  %v268_v48 = vmax.f32 %v190_v43, 0.0 }
 0x11a   :  { %v269_v49 = vmax.f32 %v193_v46, 0.0 }
 0x11c   :  { %v307_v50 = vpack.c.bf16 %v269_v49, %v268_v48 }
 0x11d   :  { %v197_v51 = vpop.f32.mrb[20].mxu0 }
 0x11e   :  { %v198_v52 = vadd.f32 %v197_v51, %v3163_v3  ;;  %v2361_v53 = vpop.f32.mrb[21].mxu0  ;;  %2424 = vmatmul.mubr.bf16.gmra.mrb[16].mxu1 %v307_v50 }
 0x11f   :  { %v200_v54 = vpop.f32.mrb[22].mxu0  ;;  %2427 = vmatprep.mubr.msk.bf16.mxu1 %vm2936_vm0, %v2935_v0 }
 0x120   :  { %v201_v55 = vadd.f32 %v200_v54, %v3163_v3  ;;  %v2362_v56 = vpop.f32.mrb[23].mxu0  ;;  %v270_v57 = vmax.f32 %v198_v52, 0.0 }
 0x122   :  { %v271_v58 = vmax.f32 %v201_v55, 0.0 }
 0x124   :  { %v308_v59 = vpack.c.bf16 %v271_v58, %v270_v57 }
 0x125   :  { %v205_v60 = vpop.f32.mrb[24].mxu0 }
 0x126   :  { %v206_v62 = vadd.f32 %v205_v60, %v3163_v3  ;;  %v2365_v63 = vpop.f32.mrb[25].mxu0  ;;  %2428 = vmatmul.mubr.bf16.gmra.mrb[20].mxu1 %v308_v59 }
 0x127   :  { %v208_v2 = vpop.f32.mrb[26].mxu0  ;;  %2431 = vmatprep.mubr.msk.bf16.mxu1 %vm2936_vm0, %v2935_v0 }
 0x128   :  { %v209_v4 = vadd.f32 %v208_v2, %v3163_v3  ;;  %v2366_v5 = vpop.f32.mrb[27].mxu0  ;;  %v272_v6 = vmax.f32 %v206_v62, 0.0  ;;  %v2893_v2 = vld [vmem:[%s3831_s1 + $0xc0] sm:$0xff]  }
 0x129   :  { %2528 = vmatpush3.bf16.msra.mxu1 %v2893_v2  ;;  %v2896_v5 = vld [vmem:[%s3831_s1 + $0xd8] sm:$0xff]  }
 0x12a   :  { %v273_v7 = vmax.f32 %v209_v4, 0.0  ;;  %v2894_v4 = vld [vmem:[%s3831_s1 + $0xc8] sm:$0xff]   ;;  %2529 = vmatprep.subr.bf16.mxu1 %v2935_v0 }
 0x12c   :  { %v309_v8 = vpack.c.bf16 %v273_v7, %v272_v6  ;;  %v2897_v6 = vld [vmem:[%s3831_s1 + $0xe0] sm:$0xff]   ;;  %v318_v7 = vsub.s32 1, %v3146_v61 }
 0x12d   :  { %v213_v9 = vpop.f32.mrb[28].mxu0  ;;  %2530 = vmatpush3.bf16.msra.mxu1 %v2894_v4 }
 0x12e   :  { %v214_v10 = vadd.f32 %v213_v9, %v3163_v3  ;;  %v2369_v11 = vpop.f32.mrb[29].mxu0  ;;  %2432 = vmatmul.mubr.bf16.gmra.mrb[24].mxu1 %v309_v8  ;;  %2531 = vmatprep.subr.bf16.mxu1 %v2935_v0  ;;  %v2898_v8 = vld [vmem:[%s3831_s1 + $0xe8] sm:$0xff]   ;;  %v3251_v9 = vrot.slane %v3156_v1, %v318_v7 }
 0x12f   :  { %v216_v12 = vpop.f32.mrb[30].mxu0  ;;  %2435 = vmatprep.mubr.msk.bf16.mxu1 %vm2936_vm0, %v2935_v0 }
 0x130   :  { %v217_v13 = vadd.f32 %v216_v12, %v3163_v3  ;;  %v2370_v14 = vpop.f32.mrb[31].mxu0  ;;  %v274_v15 = vmax.f32 %v214_v10, 0.0  ;;  %v2899_v10 = vld [vmem:[%s3831_s1 + $0xf0] sm:$0xff]  }
 0x132   :  { %v275_v16 = vmax.f32 %v217_v13, 0.0 }
 0x134   :  { %v310_v17 = vpack.c.bf16 %v275_v16, %v274_v15 }
 0x135   :  { %v221_v18 = vpop.f32.mrb[32].mxu0 }
 0x136   :  { %v222_v19 = vadd.f32 %v221_v18, %v3163_v3  ;;  %v2373_v20 = vpop.f32.mrb[33].mxu0  ;;  %2436 = vmatmul.mubr.bf16.gmra.mrb[28].mxu1 %v310_v17  ;;  %v2900_v17 = vld [vmem:[%s3831_s1 + $0xf8] sm:$0xff]  }
 0x137   :  { %v224_v21 = vpop.f32.mrb[34].mxu0  ;;  %2439 = vmatprep.mubr.msk.bf16.mxu1 %vm2936_vm0, %v2935_v0 }
 0x138   :  { %v225_v22 = vadd.f32 %v224_v21, %v3163_v3  ;;  %v2374_v23 = vpop.f32.mrb[35].mxu0  ;;  %v276_v24 = vmax.f32 %v222_v19, 0.0 }
 0x13a   :  { %v277_v25 = vmax.f32 %v225_v22, 0.0 }
 0x13c   :  { %v311_v26 = vpack.c.bf16 %v277_v25, %v276_v24 }
 0x13d   :  { %v229_v27 = vpop.f32.mrb[36].mxu0 }
 0x13e   :  { %v230_v28 = vadd.f32 %v229_v27, %v3163_v3  ;;  %v2377_v29 = vpop.f32.mrb[37].mxu0  ;;  %2440 = vmatmul.mubr.bf16.gmra.mrb[32].mxu1 %v311_v26 }
 0x13f   :  { %v232_v30 = vpop.f32.mrb[38].mxu0  ;;  %2443 = vmatprep.mubr.msk.bf16.mxu1 %vm2936_vm0, %v2935_v0 }
 0x140   :  { %v233_v31 = vadd.f32 %v232_v30, %v3163_v3  ;;  %v2378_v32 = vpop.f32.mrb[39].mxu0  ;;  %v278_v33 = vmax.f32 %v230_v28, 0.0 }
 0x142   :  { %v279_v34 = vmax.f32 %v233_v31, 0.0 }
 0x144   :  { %v312_v35 = vpack.c.bf16 %v279_v34, %v278_v33 }
 0x145   :  { %v237_v36 = vpop.f32.mrb[40].mxu0 }
 0x146   :  { %v238_v37 = vadd.f32 %v237_v36, %v3163_v3  ;;  %v2381_v38 = vpop.f32.mrb[41].mxu0  ;;  %2444 = vmatmul.mubr.bf16.gmra.mrb[36].mxu1 %v312_v35 }
 0x147   :  { %v240_v39 = vpop.f32.mrb[42].mxu0  ;;  %2447 = vmatprep.mubr.msk.bf16.mxu1 %vm2936_vm0, %v2935_v0 }
 0x148   :  { %v241_v40 = vadd.f32 %v240_v39, %v3163_v3  ;;  %v2382_v41 = vpop.f32.mrb[43].mxu0  ;;  %v280_v42 = vmax.f32 %v238_v37, 0.0 }
 0x14a   :  { %v281_v43 = vmax.f32 %v241_v40, 0.0 }
 0x14c   :  { %v313_v44 = vpack.c.bf16 %v281_v43, %v280_v42 }
 0x14d   :  { %v245_v45 = vpop.f32.mrb[44].mxu0 }
 0x14e   :  { %v246_v46 = vadd.f32 %v245_v45, %v3163_v3  ;;  %v2385_v47 = vpop.f32.mrb[45].mxu0  ;;  %2448 = vmatmul.mubr.bf16.gmra.mrb[40].mxu1 %v313_v44 }
 0x14f   :  { %v248_v48 = vpop.f32.mrb[46].mxu0  ;;  %2451 = vmatprep.mubr.msk.bf16.mxu1 %vm2936_vm0, %v2935_v0 }
 0x150   :  { %v249_v49 = vadd.f32 %v248_v48, %v3163_v3  ;;  %v2386_v50 = vpop.f32.mrb[47].mxu0  ;;  %v282_v51 = vmax.f32 %v246_v46, 0.0 }
 0x152   :  { %v283_v52 = vmax.f32 %v249_v49, 0.0 }
 0x154   :  { %v314_v53 = vpack.c.bf16 %v283_v52, %v282_v51 }
 0x155   :  { %v253_v54 = vpop.f32.mrb[48].mxu0 }
 0x156   :  { %v254_v55 = vadd.f32 %v253_v54, %v3163_v3  ;;  %v2389_v56 = vpop.f32.mrb[49].mxu0  ;;  %2452 = vmatmul.mubr.bf16.gmra.mrb[44].mxu1 %v314_v53 }
 0x157   :  { %v256_v57 = vpop.f32.mrb[50].mxu0  ;;  %2455 = vmatprep.mubr.msk.bf16.mxu1 %vm2936_vm0, %v2935_v0 }
 0x158   :  { %v257_v58 = vadd.f32 %v256_v57, %v3163_v3  ;;  %v2390_v59 = vpop.f32.mrb[51].mxu0  ;;  %v284_v60 = vmax.f32 %v254_v55, 0.0  ;;  %v2895_v3 = vld [vmem:[%s3831_s1 + $0xd0] sm:$0xff]  }
 0x159   :  { %2532 = vmatpush3.bf16.msra.mxu1 %v2895_v3 }
 0x15a   :  { %v285_v62 = vmax.f32 %v257_v58, 0.0  ;;  %2533 = vmatprep.subr.bf16.mxu1 %v2935_v0 }
 0x15c   :  { %v315_v63 = vpack.c.bf16 %v285_v62, %v284_v60 }
 0x15d   :  { %2534 = vmatpush3.bf16.msra.mxu1 %v2896_v5 }
 0x15e   :  { %2456 = vmatmul.mubr.bf16.gmra.mrb[48].mxu1 %v315_v63  ;;  %2535 = vmatprep.subr.bf16.mxu1 %v2935_v0 }
 0x15f   :  { %2543 = vmatprep.mubr.msk.bf16.mxu1 %vm2936_vm0, %v2935_v0 }
 0x161   :  { %2536 = vmatpush3.bf16.msra.mxu1 %v2897_v6 }
 0x162   :  { %2537 = vmatprep.subr.bf16.mxu1 %v2935_v0 }
 0x165   :  { %2538 = vmatpush3.bf16.msra.mxu1 %v2898_v8 }
 0x166   :  { %2539 = vmatprep.subr.bf16.mxu1 %v2935_v0 }
 0x169   :  { %2540 = vmatpush3.bf16.msra.mxu1 %v2899_v10 }
 0x16a   :  { %2541 = vmatprep.subr.bf16.mxu1 %v2935_v0 }
 0x16d   :  { %2542 = vmatpush3.bf16.msra.mxu1 %v2900_v17 }
 0x16e   :  { %2663 = vmatprep.subr.bf16.mxu1 %v2935_v0 }
 0x1d1   :  { %v402_v11 = vpop.f32.mrb[0].mxu1 }
 0x1d2   :  { %v403_v12 = vadd.f32 %v402_v11, %v3251_v9  ;;  %v2409_v13 = vpop.f32.mrb[1].mxu1 }
 0x1d3   :  { %v405_v14 = vpop.f32.mrb[2].mxu1 }
 0x1d4   :  { %v406_v15 = vadd.f32 %v405_v14, %v3251_v9  ;;  %v2410_v16 = vpop.f32.mrb[3].mxu1  ;;  %v505_v18 = vmax.f32 %v403_v12, 0.0 }
 0x1d6   :  { %v506_v19 = vmax.f32 %v406_v15, 0.0 }
 0x1d8   :  { %v548_v20 = vpack.c.bf16 %v506_v19, %v505_v18 }
 0x1d9   :  { %v410_v21 = vpop.f32.mrb[4].mxu1 }
 0x1da   :  { %v411_v22 = vadd.f32 %v410_v21, %v3251_v9  ;;  %v2413_v23 = vpop.f32.mrb[5].mxu1  ;;  %2476 = vmatmul.mubr.bf16.vlgmr.msra.gmra.mrb[52].mxu0 %v548_v20 }
 0x1db   :  { %v413_v24 = vpop.f32.mrb[6].mxu1  ;;  %2479 = vmatprep.mubr.msk.bf16.mxu0 %vm2936_vm0, %v2935_v0 }
 0x1dc   :  { %v414_v25 = vadd.f32 %v413_v24, %v3251_v9  ;;  %v2414_v26 = vpop.f32.mrb[7].mxu1  ;;  %v507_v27 = vmax.f32 %v411_v22, 0.0 }
 0x1de   :  { %v508_v28 = vmax.f32 %v414_v25, 0.0 }
 0x1e0   :  { %v549_v29 = vpack.c.bf16 %v508_v28, %v507_v27 }
 0x1e1   :  { %v418_v30 = vpop.f32.mrb[8].mxu1 }
 0x1e2   :  { %v419_v31 = vadd.f32 %v418_v30, %v3251_v9  ;;  %v2417_v32 = vpop.f32.mrb[9].mxu1  ;;  %2480 = vmatmul.mubr.bf16.gmra.mrb[56].mxu0 %v549_v29 }
 0x1e3   :  { %v421_v33 = vpop.f32.mrb[10].mxu1  ;;  %2483 = vmatprep.mubr.msk.bf16.mxu0 %vm2936_vm0, %v2935_v0 }
 0x1e4   :  { %v422_v34 = vadd.f32 %v421_v33, %v3251_v9  ;;  %v2418_v35 = vpop.f32.mrb[11].mxu1  ;;  %v509_v36 = vmax.f32 %v419_v31, 0.0 }
 0x1e6   :  { %v510_v37 = vmax.f32 %v422_v34, 0.0 }
 0x1e8   :  { %v550_v38 = vpack.c.bf16 %v510_v37, %v509_v36 }
 0x1e9   :  { %v426_v39 = vpop.f32.mrb[12].mxu1 }
 0x1ea   :  { %v427_v40 = vadd.f32 %v426_v39, %v3251_v9  ;;  %v2421_v41 = vpop.f32.mrb[13].mxu1  ;;  %2484 = vmatmul.mubr.bf16.gmra.mrb[60].mxu0 %v550_v38 }
 0x1eb   :  { %v429_v42 = vpop.f32.mrb[14].mxu1  ;;  %2487 = vmatprep.mubr.msk.bf16.mxu0 %vm2936_vm0, %v2935_v0 }
 0x1ec   :  { %v430_v43 = vadd.f32 %v429_v42, %v3251_v9  ;;  %v2422_v44 = vpop.f32.mrb[15].mxu1  ;;  %v511_v45 = vmax.f32 %v427_v40, 0.0 }
 0x1ee   :  { %v512_v46 = vmax.f32 %v430_v43, 0.0 }
 0x1f0   :  { %v551_v47 = vpack.c.bf16 %v512_v46, %v511_v45 }
 0x1f1   :  { %v434_v48 = vpop.f32.mrb[16].mxu1 }
 0x1f2   :  { %v435_v49 = vadd.f32 %v434_v48, %v3251_v9  ;;  %v2425_v50 = vpop.f32.mrb[17].mxu1  ;;  %2488 = vmatmul.mubr.bf16.gmra.mrb[64].mxu0 %v551_v47 }
 0x1f3   :  { %v437_v51 = vpop.f32.mrb[18].mxu1  ;;  %2491 = vmatprep.mubr.msk.bf16.mxu0 %vm2936_vm0, %v2935_v0 }
 0x1f4   :  { %v438_v52 = vadd.f32 %v437_v51, %v3251_v9  ;;  %v2426_v53 = vpop.f32.mrb[19].mxu1  ;;  %v513_v54 = vmax.f32 %v435_v49, 0.0 }
 0x1f6   :  { %v514_v55 = vmax.f32 %v438_v52, 0.0 }
 0x1f8   :  { %v552_v56 = vpack.c.bf16 %v514_v55, %v513_v54 }
 0x1f9   :  { %v442_v57 = vpop.f32.mrb[20].mxu1 }
 0x1fa   :  { %v443_v58 = vadd.f32 %v442_v57, %v3251_v9  ;;  %v2429_v59 = vpop.f32.mrb[21].mxu1  ;;  %2492 = vmatmul.mubr.bf16.gmra.mrb[68].mxu0 %v552_v56 }
 0x1fb   :  { %v445_v60 = vpop.f32.mrb[22].mxu1  ;;  %2495 = vmatprep.mubr.msk.bf16.mxu0 %vm2936_vm0, %v2935_v0 }
 0x1fc   :  { %v446_v62 = vadd.f32 %v445_v60, %v3251_v9  ;;  %v2430_v63 = vpop.f32.mrb[23].mxu1  ;;  %v515_v2 = vmax.f32 %v443_v58, 0.0 }
 0x1fe   :  { %v516_v4 = vmax.f32 %v446_v62, 0.0 }
 0x200   :  { %v553_v3 = vpack.c.bf16 %v516_v4, %v515_v2 }
 0x201   :  { %v450_v5 = vpop.f32.mrb[24].mxu1 }
 0x202   :  { %v451_v6 = vadd.f32 %v450_v5, %v3251_v9  ;;  %v2433_v7 = vpop.f32.mrb[25].mxu1  ;;  %2496 = vmatmul.mubr.bf16.gmra.mrb[72].mxu0 %v553_v3 }
 0x203   :  { %v453_v8 = vpop.f32.mrb[26].mxu1  ;;  %2499 = vmatprep.mubr.msk.bf16.mxu0 %vm2936_vm0, %v2935_v0 }
 0x204   :  { %v454_v10 = vadd.f32 %v453_v8, %v3251_v9  ;;  %v2434_v11 = vpop.f32.mrb[27].mxu1  ;;  %v517_v12 = vmax.f32 %v451_v6, 0.0  ;;  %v2901_v8 = vld [vmem:[%s3831_s1 + $0x100] sm:$0xff]  }
 0x205   :  { %2596 = vmatpush3.bf16.msra.mxu0 %v2901_v8  ;;  %v2904_v11 = vld [vmem:[%s3831_s1 + $0x118] sm:$0xff]  }
 0x206   :  { %v518_v13 = vmax.f32 %v454_v10, 0.0  ;;  %v2902_v10 = vld [vmem:[%s3831_s1 + $0x108] sm:$0xff]   ;;  %2597 = vmatprep.subr.bf16.mxu0 %v2935_v0 }
 0x208   :  { %v554_v14 = vpack.c.bf16 %v518_v13, %v517_v12  ;;  %v2905_v12 = vld [vmem:[%s3831_s1 + $0x120] sm:$0xff]   ;;  %v563_v13 = vsub.s32 2, %v3146_v61 }
 0x209   :  { %v458_v15 = vpop.f32.mrb[28].mxu1  ;;  %2598 = vmatpush3.bf16.msra.mxu0 %v2902_v10 }
 0x20a   :  { %v459_v16 = vadd.f32 %v458_v15, %v3251_v9  ;;  %v2437_v17 = vpop.f32.mrb[29].mxu1  ;;  %2500 = vmatmul.mubr.bf16.gmra.mrb[76].mxu0 %v554_v14  ;;  %2599 = vmatprep.subr.bf16.mxu0 %v2935_v0  ;;  %v2906_v14 = vld [vmem:[%s3831_s1 + $0x128] sm:$0xff]   ;;  %v3339_v15 = vrot.slane %v3156_v1, %v563_v13  ;;  %v2908_v1 = vld [vmem:[%s3831_s1 + $0x138] sm:$0xff]  }
 0x20b   :  { %v461_v18 = vpop.f32.mrb[30].mxu1  ;;  %2503 = vmatprep.mubr.msk.bf16.mxu0 %vm2936_vm0, %v2935_v0 }
 0x20c   :  { %v462_v19 = vadd.f32 %v461_v18, %v3251_v9  ;;  %v2438_v20 = vpop.f32.mrb[31].mxu1  ;;  %v519_v21 = vmax.f32 %v459_v16, 0.0  ;;  %v2907_v16 = vld [vmem:[%s3831_s1 + $0x130] sm:$0xff]  }
 0x20e   :  { %v520_v22 = vmax.f32 %v462_v19, 0.0 }
 0x210   :  { %v555_v23 = vpack.c.bf16 %v520_v22, %v519_v21 }
 0x211   :  { %v466_v24 = vpop.f32.mrb[32].mxu1 }
 0x212   :  { %v467_v25 = vadd.f32 %v466_v24, %v3251_v9  ;;  %v2441_v26 = vpop.f32.mrb[33].mxu1  ;;  %2504 = vmatmul.mubr.bf16.gmra.mrb[80].mxu0 %v555_v23 }
 0x213   :  { %v469_v27 = vpop.f32.mrb[34].mxu1  ;;  %2507 = vmatprep.mubr.msk.bf16.mxu0 %vm2936_vm0, %v2935_v0 }
 0x214   :  { %v470_v28 = vadd.f32 %v469_v27, %v3251_v9  ;;  %v2442_v29 = vpop.f32.mrb[35].mxu1  ;;  %v521_v30 = vmax.f32 %v467_v25, 0.0 }
 0x216   :  { %v522_v31 = vmax.f32 %v470_v28, 0.0 }
 0x218   :  { %v556_v32 = vpack.c.bf16 %v522_v31, %v521_v30 }
 0x219   :  { %v474_v33 = vpop.f32.mrb[36].mxu1 }
 0x21a   :  { %v475_v34 = vadd.f32 %v474_v33, %v3251_v9  ;;  %v2445_v35 = vpop.f32.mrb[37].mxu1  ;;  %2508 = vmatmul.mubr.bf16.gmra.mrb[84].mxu0 %v556_v32 }
 0x21b   :  { %v477_v36 = vpop.f32.mrb[38].mxu1  ;;  %2511 = vmatprep.mubr.msk.bf16.mxu0 %vm2936_vm0, %v2935_v0 }
 0x21c   :  { %v478_v37 = vadd.f32 %v477_v36, %v3251_v9  ;;  %v2446_v38 = vpop.f32.mrb[39].mxu1  ;;  %v523_v39 = vmax.f32 %v475_v34, 0.0 }
 0x21e   :  { %v524_v40 = vmax.f32 %v478_v37, 0.0 }
 0x220   :  { %v557_v41 = vpack.c.bf16 %v524_v40, %v523_v39 }
 0x221   :  { %v482_v42 = vpop.f32.mrb[40].mxu1 }
 0x222   :  { %v483_v43 = vadd.f32 %v482_v42, %v3251_v9  ;;  %v2449_v44 = vpop.f32.mrb[41].mxu1  ;;  %2512 = vmatmul.mubr.bf16.gmra.mrb[88].mxu0 %v557_v41 }
 0x223   :  { %v485_v45 = vpop.f32.mrb[42].mxu1  ;;  %2515 = vmatprep.mubr.msk.bf16.mxu0 %vm2936_vm0, %v2935_v0 }
 0x224   :  { %v486_v46 = vadd.f32 %v485_v45, %v3251_v9  ;;  %v2450_v47 = vpop.f32.mrb[43].mxu1  ;;  %v525_v48 = vmax.f32 %v483_v43, 0.0 }
 0x226   :  { %v526_v49 = vmax.f32 %v486_v46, 0.0 }
 0x228   :  { %v558_v50 = vpack.c.bf16 %v526_v49, %v525_v48 }
 0x229   :  { %v490_v51 = vpop.f32.mrb[44].mxu1 }
 0x22a   :  { %v491_v52 = vadd.f32 %v490_v51, %v3251_v9  ;;  %v2453_v53 = vpop.f32.mrb[45].mxu1  ;;  %2516 = vmatmul.mubr.bf16.gmra.mrb[92].mxu0 %v558_v50 }
 0x22b   :  { %v493_v54 = vpop.f32.mrb[46].mxu1  ;;  %2519 = vmatprep.mubr.msk.bf16.mxu0 %vm2936_vm0, %v2935_v0 }
 0x22c   :  { %v494_v55 = vadd.f32 %v493_v54, %v3251_v9  ;;  %v2454_v56 = vpop.f32.mrb[47].mxu1  ;;  %v527_v57 = vmax.f32 %v491_v52, 0.0 }
 0x22e   :  { %v528_v58 = vmax.f32 %v494_v55, 0.0 }
 0x230   :  { %v559_v59 = vpack.c.bf16 %v528_v58, %v527_v57 }
 0x231   :  { %v498_v60 = vpop.f32.mrb[48].mxu1 }
 0x232   :  { %v499_v62 = vadd.f32 %v498_v60, %v3251_v9  ;;  %v2457_v63 = vpop.f32.mrb[49].mxu1  ;;  %2520 = vmatmul.mubr.bf16.gmra.mrb[96].mxu0 %v559_v59 }
 0x233   :  { %v501_v2 = vpop.f32.mrb[50].mxu1  ;;  %2523 = vmatprep.mubr.msk.bf16.mxu0 %vm2936_vm0, %v2935_v0 }
 0x234   :  { %v502_v4 = vadd.f32 %v501_v2, %v3251_v9  ;;  %v2458_v3 = vpop.f32.mrb[51].mxu1  ;;  %v529_v5 = vmax.f32 %v499_v62, 0.0  ;;  %v2903_v9 = vld [vmem:[%s3831_s1 + $0x110] sm:$0xff]  }
 0x235   :  { %2600 = vmatpush3.bf16.msra.mxu0 %v2903_v9 }
 0x236   :  { %v530_v6 = vmax.f32 %v502_v4, 0.0  ;;  %2601 = vmatprep.subr.bf16.mxu0 %v2935_v0 }
 0x238   :  { %v560_v7 = vpack.c.bf16 %v530_v6, %v529_v5 }
 0x239   :  { %2602 = vmatpush3.bf16.msra.mxu0 %v2904_v11 }
 0x23a   :  { %2524 = vmatmul.mubr.bf16.gmra.mrb[100].mxu0 %v560_v7  ;;  %2603 = vmatprep.subr.bf16.mxu0 %v2935_v0 }
 0x23b   :  { %2611 = vmatprep.mubr.msk.bf16.mxu0 %vm2936_vm0, %v2935_v0 }
 0x23d   :  { %2604 = vmatpush3.bf16.msra.mxu0 %v2905_v12 }
 0x23e   :  { %2605 = vmatprep.subr.bf16.mxu0 %v2935_v0 }
 0x241   :  { %2606 = vmatpush3.bf16.msra.mxu0 %v2906_v14 }
 0x242   :  { %2607 = vmatprep.subr.bf16.mxu0 %v2935_v0 }
 0x245   :  { %2608 = vmatpush3.bf16.msra.mxu0 %v2907_v16 }
 0x246   :  { %2609 = vmatprep.subr.bf16.mxu0 %v2935_v0 }
 0x249   :  { %2610 = vmatpush3.bf16.msra.mxu0 %v2908_v1 }
 0x24a   :  { %2731 = vmatprep.subr.bf16.mxu0 %v2935_v0 }
 0x2ad   :  { %v647_v17 = vpop.f32.mrb[52].mxu0 }
 0x2ae   :  { %v648_v18 = vadd.f32 %v647_v17, %v3339_v15  ;;  %v2477_v19 = vpop.f32.mrb[53].mxu0 }
 0x2af   :  { %v650_v20 = vpop.f32.mrb[54].mxu0 }
 0x2b0   :  { %v651_v21 = vadd.f32 %v650_v20, %v3339_v15  ;;  %v2478_v22 = vpop.f32.mrb[55].mxu0  ;;  %v750_v23 = vmax.f32 %v648_v18, 0.0 }
 0x2b2   :  { %v751_v24 = vmax.f32 %v651_v21, 0.0 }
 0x2b4   :  { %v793_v25 = vpack.c.bf16 %v751_v24, %v750_v23 }
 0x2b5   :  { %v655_v26 = vpop.f32.mrb[56].mxu0 }
 0x2b6   :  { %v656_v27 = vadd.f32 %v655_v26, %v3339_v15  ;;  %v2481_v28 = vpop.f32.mrb[57].mxu0  ;;  %2544 = vmatmul.mubr.bf16.vlgmr.msra.gmra.mrb[52].mxu1 %v793_v25 }
 0x2b7   :  { %v658_v29 = vpop.f32.mrb[58].mxu0  ;;  %2547 = vmatprep.mubr.msk.bf16.mxu1 %vm2936_vm0, %v2935_v0 }
 0x2b8   :  { %v659_v30 = vadd.f32 %v658_v29, %v3339_v15  ;;  %v2482_v31 = vpop.f32.mrb[59].mxu0  ;;  %v752_v32 = vmax.f32 %v656_v27, 0.0 }
 0x2ba   :  { %v753_v33 = vmax.f32 %v659_v30, 0.0 }
 0x2bc   :  { %v794_v34 = vpack.c.bf16 %v753_v33, %v752_v32 }
 0x2bd   :  { %v663_v35 = vpop.f32.mrb[60].mxu0 }
 0x2be   :  { %v664_v36 = vadd.f32 %v663_v35, %v3339_v15  ;;  %v2485_v37 = vpop.f32.mrb[61].mxu0  ;;  %2548 = vmatmul.mubr.bf16.gmra.mrb[56].mxu1 %v794_v34 }
 0x2bf   :  { %v666_v38 = vpop.f32.mrb[62].mxu0  ;;  %2551 = vmatprep.mubr.msk.bf16.mxu1 %vm2936_vm0, %v2935_v0 }
 0x2c0   :  { %v667_v39 = vadd.f32 %v666_v38, %v3339_v15  ;;  %v2486_v40 = vpop.f32.mrb[63].mxu0  ;;  %v754_v41 = vmax.f32 %v664_v36, 0.0 }
 0x2c2   :  { %v755_v42 = vmax.f32 %v667_v39, 0.0 }
 0x2c4   :  { %v795_v43 = vpack.c.bf16 %v755_v42, %v754_v41 }
 0x2c5   :  { %v671_v44 = vpop.f32.mrb[64].mxu0 }
 0x2c6   :  { %v672_v45 = vadd.f32 %v671_v44, %v3339_v15  ;;  %v2489_v46 = vpop.f32.mrb[65].mxu0  ;;  %2552 = vmatmul.mubr.bf16.gmra.mrb[60].mxu1 %v795_v43 }
 0x2c7   :  { %v674_v47 = vpop.f32.mrb[66].mxu0  ;;  %2555 = vmatprep.mubr.msk.bf16.mxu1 %vm2936_vm0, %v2935_v0 }
 0x2c8   :  { %v675_v48 = vadd.f32 %v674_v47, %v3339_v15  ;;  %v2490_v49 = vpop.f32.mrb[67].mxu0  ;;  %v756_v50 = vmax.f32 %v672_v45, 0.0 }
 0x2ca   :  { %v757_v51 = vmax.f32 %v675_v48, 0.0 }
 0x2cc   :  { %v796_v52 = vpack.c.bf16 %v757_v51, %v756_v50 }
 0x2cd   :  { %v679_v53 = vpop.f32.mrb[68].mxu0 }
 0x2ce   :  { %v680_v54 = vadd.f32 %v679_v53, %v3339_v15  ;;  %v2493_v55 = vpop.f32.mrb[69].mxu0  ;;  %2556 = vmatmul.mubr.bf16.gmra.mrb[64].mxu1 %v796_v52 }
 0x2cf   :  { %v682_v56 = vpop.f32.mrb[70].mxu0  ;;  %2559 = vmatprep.mubr.msk.bf16.mxu1 %vm2936_vm0, %v2935_v0 }
 0x2d0   :  { %v683_v57 = vadd.f32 %v682_v56, %v3339_v15  ;;  %v2494_v58 = vpop.f32.mrb[71].mxu0  ;;  %v758_v59 = vmax.f32 %v680_v54, 0.0 }
 0x2d2   :  { %v759_v60 = vmax.f32 %v683_v57, 0.0 }
 0x2d4   :  { %v797_v62 = vpack.c.bf16 %v759_v60, %v758_v59 }
 0x2d5   :  { %v687_v63 = vpop.f32.mrb[72].mxu0 }
 0x2d6   :  { %v688_v2 = vadd.f32 %v687_v63, %v3339_v15  ;;  %v2497_v4 = vpop.f32.mrb[73].mxu0  ;;  %2560 = vmatmul.mubr.bf16.gmra.mrb[68].mxu1 %v797_v62 }
 0x2d7   :  { %v690_v3 = vpop.f32.mrb[74].mxu0  ;;  %2563 = vmatprep.mubr.msk.bf16.mxu1 %vm2936_vm0, %v2935_v0 }
 0x2d8   :  { %v691_v5 = vadd.f32 %v690_v3, %v3339_v15  ;;  %v2498_v6 = vpop.f32.mrb[75].mxu0  ;;  %v760_v7 = vmax.f32 %v688_v2, 0.0 }
 0x2da   :  { %v761_v8 = vmax.f32 %v691_v5, 0.0 }
 0x2dc   :  { %v798_v10 = vpack.c.bf16 %v761_v8, %v760_v7 }
 0x2dd   :  { %v695_v9 = vpop.f32.mrb[76].mxu0 }
 0x2de   :  { %v696_v11 = vadd.f32 %v695_v9, %v3339_v15  ;;  %v2501_v12 = vpop.f32.mrb[77].mxu0  ;;  %2564 = vmatmul.mubr.bf16.gmra.mrb[72].mxu1 %v798_v10 }
 0x2df   :  { %v698_v13 = vpop.f32.mrb[78].mxu0  ;;  %2567 = vmatprep.mubr.msk.bf16.mxu1 %vm2936_vm0, %v2935_v0  ;;  %v2909_v12 = vld [vmem:[%s3831_s1 + $0x140] sm:$0xff]  }
 0x2e0   :  { %v699_v14 = vadd.f32 %v698_v13, %v3339_v15  ;;  %v2502_v16 = vpop.f32.mrb[79].mxu0  ;;  %v762_v17 = vmax.f32 %v696_v11, 0.0  ;;  %2664 = vmatpush3.bf16.msra.mxu1 %v2909_v12  ;;  %v2910_v13 = vld [vmem:[%s3831_s1 + $0x148] sm:$0xff]  }
 0x2e1   :  { %2665 = vmatprep.subr.bf16.mxu1 %v2935_v0  ;;  %v2913_v16 = vld [vmem:[%s3831_s1 + $0x160] sm:$0xff]  }
 0x2e2   :  { %v763_v18 = vmax.f32 %v699_v14, 0.0  ;;  %v2912_v14 = vld [vmem:[%s3831_s1 + $0x158] sm:$0xff]  }
 0x2e4   :  { %v799_v19 = vpack.c.bf16 %v763_v18, %v762_v17  ;;  %2666 = vmatpush3.bf16.msra.mxu1 %v2910_v13  ;;  %v2914_v17 = vld [vmem:[%s3831_s1 + $0x168] sm:$0xff]   ;;  %v808_v18 = vsub.s32 3, %v3146_v61 }
 0x2e5   :  { %v703_v20 = vpop.f32.mrb[80].mxu0  ;;  %2667 = vmatprep.subr.bf16.mxu1 %v2935_v0 }
 0x2e6   :  { %v704_v21 = vadd.f32 %v703_v20, %v3339_v15  ;;  %v2505_v22 = vpop.f32.mrb[81].mxu0  ;;  %2568 = vmatmul.mubr.bf16.gmra.mrb[76].mxu1 %v799_v19  ;;  %v2915_v19 = vld [vmem:[%s3831_s1 + $0x170] sm:$0xff]   ;;  %v3433_v20 = vld [vmem:[%s3833_s2] sm:$0xff] }
 0x2e7   :  { %v706_v1 = vpop.f32.mrb[82].mxu0  ;;  %2571 = vmatprep.mubr.msk.bf16.mxu1 %vm2936_vm0, %v2935_v0 }
 0x2e8   :  { %v707_v23 = vadd.f32 %v706_v1, %v3339_v15  ;;  %v2506_v24 = vpop.f32.mrb[83].mxu0  ;;  %v764_v25 = vmax.f32 %v704_v21, 0.0  ;;  %v3436_v21 = vrot.slane %v3433_v20, %v808_v18 }
 0x2ea   :  { %v765_v26 = vmax.f32 %v707_v23, 0.0  ;;  %v2916_v23 = vld [vmem:[%s3831_s1 + $0x178] sm:$0xff]  }
 0x2ec   :  { %v800_v27 = vpack.c.bf16 %v765_v26, %v764_v25 }
 0x2ed   :  { %v711_v28 = vpop.f32.mrb[84].mxu0 }
 0x2ee   :  { %v712_v29 = vadd.f32 %v711_v28, %v3339_v15  ;;  %v2509_v30 = vpop.f32.mrb[85].mxu0  ;;  %2572 = vmatmul.mubr.bf16.gmra.mrb[80].mxu1 %v800_v27 }
 0x2ef   :  { %v714_v31 = vpop.f32.mrb[86].mxu0  ;;  %2575 = vmatprep.mubr.msk.bf16.mxu1 %vm2936_vm0, %v2935_v0 }
 0x2f0   :  { %v715_v32 = vadd.f32 %v714_v31, %v3339_v15  ;;  %v2510_v33 = vpop.f32.mrb[87].mxu0  ;;  %v766_v34 = vmax.f32 %v712_v29, 0.0 }
 0x2f2   :  { %v767_v35 = vmax.f32 %v715_v32, 0.0 }
 0x2f4   :  { %v801_v36 = vpack.c.bf16 %v767_v35, %v766_v34 }
 0x2f5   :  { %v719_v37 = vpop.f32.mrb[88].mxu0 }
 0x2f6   :  { %v720_v38 = vadd.f32 %v719_v37, %v3339_v15  ;;  %v2513_v39 = vpop.f32.mrb[89].mxu0  ;;  %2576 = vmatmul.mubr.bf16.gmra.mrb[84].mxu1 %v801_v36 }
 0x2f7   :  { %v722_v40 = vpop.f32.mrb[90].mxu0  ;;  %2579 = vmatprep.mubr.msk.bf16.mxu1 %vm2936_vm0, %v2935_v0 }
 0x2f8   :  { %v723_v41 = vadd.f32 %v722_v40, %v3339_v15  ;;  %v2514_v42 = vpop.f32.mrb[91].mxu0  ;;  %v768_v43 = vmax.f32 %v720_v38, 0.0 }
 0x2fa   :  { %v769_v44 = vmax.f32 %v723_v41, 0.0 }
 0x2fc   :  { %v802_v45 = vpack.c.bf16 %v769_v44, %v768_v43 }
 0x2fd   :  { %v727_v46 = vpop.f32.mrb[92].mxu0 }
 0x2fe   :  { %v728_v47 = vadd.f32 %v727_v46, %v3339_v15  ;;  %v2517_v48 = vpop.f32.mrb[93].mxu0  ;;  %2580 = vmatmul.mubr.bf16.gmra.mrb[88].mxu1 %v802_v45 }
 0x2ff   :  { %v730_v49 = vpop.f32.mrb[94].mxu0  ;;  %2583 = vmatprep.mubr.msk.bf16.mxu1 %vm2936_vm0, %v2935_v0 }
 0x300   :  { %v731_v50 = vadd.f32 %v730_v49, %v3339_v15  ;;  %v2518_v51 = vpop.f32.mrb[95].mxu0  ;;  %v770_v52 = vmax.f32 %v728_v47, 0.0 }
 0x302   :  { %v771_v53 = vmax.f32 %v731_v50, 0.0 }
 0x304   :  { %v803_v54 = vpack.c.bf16 %v771_v53, %v770_v52 }
 0x305   :  { %v735_v55 = vpop.f32.mrb[96].mxu0 }
 0x306   :  { %v736_v56 = vadd.f32 %v735_v55, %v3339_v15  ;;  %v2521_v57 = vpop.f32.mrb[97].mxu0  ;;  %2584 = vmatmul.mubr.bf16.gmra.mrb[92].mxu1 %v803_v54 }
 0x307   :  { %v738_v58 = vpop.f32.mrb[98].mxu0  ;;  %2587 = vmatprep.mubr.msk.bf16.mxu1 %vm2936_vm0, %v2935_v0 }
 0x308   :  { %v739_v59 = vadd.f32 %v738_v58, %v3339_v15  ;;  %v2522_v60 = vpop.f32.mrb[99].mxu0  ;;  %v772_v62 = vmax.f32 %v736_v56, 0.0 }
 0x30a   :  { %v773_v63 = vmax.f32 %v739_v59, 0.0 }
 0x30c   :  { %v804_v2 = vpack.c.bf16 %v773_v63, %v772_v62 }
 0x30d   :  { %v743_v4 = vpop.f32.mrb[100].mxu0 }
 0x30e   :  { %v744_v3 = vadd.f32 %v743_v4, %v3339_v15  ;;  %v2525_v5 = vpop.f32.mrb[101].mxu0  ;;  %2588 = vmatmul.mubr.bf16.gmra.mrb[96].mxu1 %v804_v2 }
 0x30f   :  { %v746_v6 = vpop.f32.mrb[102].mxu0  ;;  %2591 = vmatprep.mubr.msk.bf16.mxu1 %vm2936_vm0, %v2935_v0 }
 0x310   :  { %v747_v7 = vadd.f32 %v746_v6, %v3339_v15  ;;  %v2526_v8 = vpop.f32.mrb[103].mxu0  ;;  %v774_v10 = vmax.f32 %v744_v3, 0.0  ;;  %v2911_v15 = vld [vmem:[%s3831_s1 + $0x150] sm:$0xff]  }
 0x311   :  { %2668 = vmatpush3.bf16.msra.mxu1 %v2911_v15 }
 0x312   :  { %v775_v9 = vmax.f32 %v747_v7, 0.0  ;;  %2669 = vmatprep.subr.bf16.mxu1 %v2935_v0 }
 0x314   :  { %v805_v11 = vpack.c.bf16 %v775_v9, %v774_v10 }
 0x315   :  { %2670 = vmatpush3.bf16.msra.mxu1 %v2912_v14 }
 0x316   :  { %2592 = vmatmul.mubr.bf16.gmra.mrb[100].mxu1 %v805_v11  ;;  %2671 = vmatprep.subr.bf16.mxu1 %v2935_v0 }
 0x317   :  { %2679 = vmatprep.mubr.msk.bf16.mxu1 %vm2936_vm0, %v2935_v0 }
 0x319   :  { %2672 = vmatpush3.bf16.msra.mxu1 %v2913_v16 }
 0x31a   :  { %2673 = vmatprep.subr.bf16.mxu1 %v2935_v0 }
 0x31d   :  { %2674 = vmatpush3.bf16.msra.mxu1 %v2914_v17 }
 0x31e   :  { %2675 = vmatprep.subr.bf16.mxu1 %v2935_v0 }
 0x321   :  { %2676 = vmatpush3.bf16.msra.mxu1 %v2915_v19 }
 0x322   :  { %2677 = vmatprep.subr.bf16.mxu1 %v2935_v0 }
 0x325   :  { %2678 = vmatpush3.bf16.msra.mxu1 %v2916_v23 }
 0x326   :  { %2799 = vmatprep.subr.bf16.mxu1 %v2935_v0 }
 0x389   :  { %v892_v22 = vpop.f32.mrb[52].mxu1 }
 0x38a   :  { %v2545_v1 = vpop.f32.mrb[53].mxu1  ;;  %v893_v25 = vadd.f32 %v892_v22, %v3436_v21 }
 0x38b   :  { %v895_v24 = vpop.f32.mrb[54].mxu1 }
 0x38c   :  { %v896_v26 = vadd.f32 %v895_v24, %v3436_v21  ;;  %v2546_v27 = vpop.f32.mrb[55].mxu1 }
 0x38e   :  { %v1012_v28 = vpack.c.bf16 %v896_v26, %v893_v25 }
 0x390   :  { %2612 = vmatmul.mubr.bf16.vlgmr.msra.gmra.mrb[104].mxu0 %v1012_v28 }
 0x391   :  { %v900_v29 = vpop.f32.mrb[56].mxu1  ;;  %2615 = vmatprep.mubr.msk.bf16.mxu0 %vm2936_vm0, %v2935_v0 }
 0x392   :  { %v2549_v30 = vpop.f32.mrb[57].mxu1  ;;  %v901_v32 = vadd.f32 %v900_v29, %v3436_v21 }
 0x393   :  { %v903_v31 = vpop.f32.mrb[58].mxu1 }
 0x394   :  { %v904_v33 = vadd.f32 %v903_v31, %v3436_v21  ;;  %v2550_v34 = vpop.f32.mrb[59].mxu1 }
 0x396   :  { %v1013_v35 = vpack.c.bf16 %v904_v33, %v901_v32 }
 0x398   :  { %2616 = vmatmul.mubr.bf16.gmra.mrb[108].mxu0 %v1013_v35 }
 0x399   :  { %v908_v36 = vpop.f32.mrb[60].mxu1  ;;  %2619 = vmatprep.mubr.msk.bf16.mxu0 %vm2936_vm0, %v2935_v0 }
 0x39a   :  { %v2553_v37 = vpop.f32.mrb[61].mxu1  ;;  %v909_v39 = vadd.f32 %v908_v36, %v3436_v21 }
 0x39b   :  { %v911_v38 = vpop.f32.mrb[62].mxu1 }
 0x39c   :  { %v912_v40 = vadd.f32 %v911_v38, %v3436_v21  ;;  %v2554_v41 = vpop.f32.mrb[63].mxu1 }
 0x39e   :  { %v1014_v42 = vpack.c.bf16 %v912_v40, %v909_v39 }
 0x3a0   :  { %2620 = vmatmul.mubr.bf16.gmra.mrb[112].mxu0 %v1014_v42 }
 0x3a1   :  { %v916_v43 = vpop.f32.mrb[64].mxu1  ;;  %2623 = vmatprep.mubr.msk.bf16.mxu0 %vm2936_vm0, %v2935_v0 }
 0x3a2   :  { %v2557_v44 = vpop.f32.mrb[65].mxu1  ;;  %v917_v46 = vadd.f32 %v916_v43, %v3436_v21 }
 0x3a3   :  { %v919_v45 = vpop.f32.mrb[66].mxu1 }
 0x3a4   :  { %v920_v47 = vadd.f32 %v919_v45, %v3436_v21  ;;  %v2558_v48 = vpop.f32.mrb[67].mxu1 }
 0x3a6   :  { %v1015_v49 = vpack.c.bf16 %v920_v47, %v917_v46 }
 0x3a8   :  { %2624 = vmatmul.mubr.bf16.gmra.mrb[116].mxu0 %v1015_v49 }
 0x3a9   :  { %v924_v50 = vpop.f32.mrb[68].mxu1  ;;  %2627 = vmatprep.mubr.msk.bf16.mxu0 %vm2936_vm0, %v2935_v0 }
 0x3aa   :  { %v2561_v51 = vpop.f32.mrb[69].mxu1  ;;  %v925_v53 = vadd.f32 %v924_v50, %v3436_v21 }
 0x3ab   :  { %v927_v52 = vpop.f32.mrb[70].mxu1 }
 0x3ac   :  { %v928_v54 = vadd.f32 %v927_v52, %v3436_v21  ;;  %v2562_v55 = vpop.f32.mrb[71].mxu1 }
 0x3ad   :  { %v2920_v55 = vld [vmem:[%s3831_s1 + $0x198] sm:$0xff]  }
 0x3ae   :  { %v1016_v56 = vpack.c.bf16 %v928_v54, %v925_v53  ;;  %v2917_v53 = vld [vmem:[%s3831_s1 + $0x180] sm:$0xff]   ;;  %v2918_v54 = vld [vmem:[%s3831_s1 + $0x188] sm:$0xff]  }
 0x3af   :  { %2732 = vmatpush3.bf16.msra.mxu0 %v2917_v53 }
 0x3b0   :  { %2628 = vmatmul.mubr.bf16.gmra.mrb[120].mxu0 %v1016_v56  ;;  %2733 = vmatprep.subr.bf16.mxu0 %v2935_v0  ;;  %v2921_v56 = vld [vmem:[%s3831_s1 + $0x1a0] sm:$0xff]  }
 0x3b1   :  { %v932_v57 = vpop.f32.mrb[72].mxu1  ;;  %2631 = vmatprep.mubr.msk.bf16.mxu0 %vm2936_vm0, %v2935_v0 }
 0x3b2   :  { %v2565_v58 = vpop.f32.mrb[73].mxu1  ;;  %v933_v60 = vadd.f32 %v932_v57, %v3436_v21  ;;  %v1027_v57 = vsub.s32 4, %v3146_v61 }
 0x3b3   :  { %v935_v59 = vpop.f32.mrb[74].mxu1  ;;  %2734 = vmatpush3.bf16.msra.mxu0 %v2918_v54  ;;  %v2922_v58 = vld [vmem:[%s3831_s1 + $0x1a8] sm:$0xff]  }
 0x3b4   :  { %v936_v62 = vadd.f32 %v935_v59, %v3436_v21  ;;  %v2566_v63 = vpop.f32.mrb[75].mxu1  ;;  %2735 = vmatprep.subr.bf16.mxu0 %v2935_v0  ;;  %v3520_v59 = vrot.slane %v3433_v20, %v1027_v57 }
 0x3b6   :  { %v1017_v2 = vpack.c.bf16 %v936_v62, %v933_v60  ;;  %v2923_v60 = vld [vmem:[%s3831_s1 + $0x1b0] sm:$0xff]  }
 0x3b8   :  { %2632 = vmatmul.mubr.bf16.gmra.mrb[124].mxu0 %v1017_v2 }
 0x3b9   :  { %v940_v4 = vpop.f32.mrb[76].mxu1  ;;  %2635 = vmatprep.mubr.msk.bf16.mxu0 %vm2936_vm0, %v2935_v0 }
 0x3ba   :  { %v2569_v3 = vpop.f32.mrb[77].mxu1  ;;  %v941_v6 = vadd.f32 %v940_v4, %v3436_v21 }
 0x3bb   :  { %v943_v5 = vpop.f32.mrb[78].mxu1 }
 0x3bc   :  { %v944_v7 = vadd.f32 %v943_v5, %v3436_v21  ;;  %v2570_v8 = vpop.f32.mrb[79].mxu1 }
 0x3be   :  { %v1018_v10 = vpack.c.bf16 %v944_v7, %v941_v6  ;;  %v2924_v6 = vld [vmem:[%s3831_s1 + $0x1b8] sm:$0xff]  }
 0x3c0   :  { %2636 = vmatmul.mubr.bf16.gmra.mrb[128].mxu0 %v1018_v10 }
 0x3c1   :  { %v948_v9 = vpop.f32.mrb[80].mxu1  ;;  %2639 = vmatprep.mubr.msk.bf16.mxu0 %vm2936_vm0, %v2935_v0 }
 0x3c2   :  { %v2573_v11 = vpop.f32.mrb[81].mxu1  ;;  %v949_v13 = vadd.f32 %v948_v9, %v3436_v21 }
 0x3c3   :  { %v951_v12 = vpop.f32.mrb[82].mxu1 }
 0x3c4   :  { %v952_v15 = vadd.f32 %v951_v12, %v3436_v21  ;;  %v2574_v14 = vpop.f32.mrb[83].mxu1 }
 0x3c6   :  { %v1019_v16 = vpack.c.bf16 %v952_v15, %v949_v13 }
 0x3c8   :  { %2640 = vmatmul.mubr.bf16.gmra.mrb[132].mxu0 %v1019_v16 }
 0x3c9   :  { %v956_v17 = vpop.f32.mrb[84].mxu1  ;;  %2643 = vmatprep.mubr.msk.bf16.mxu0 %vm2936_vm0, %v2935_v0 }
 0x3ca   :  { %v2577_v18 = vpop.f32.mrb[85].mxu1  ;;  %v957_v22 = vadd.f32 %v956_v17, %v3436_v21 }
 0x3cb   :  { %v959_v19 = vpop.f32.mrb[86].mxu1 }
 0x3cc   :  { %v960_v1 = vadd.f32 %v959_v19, %v3436_v21  ;;  %v2578_v23 = vpop.f32.mrb[87].mxu1 }
 0x3ce   :  { %v1020_v24 = vpack.c.bf16 %v960_v1, %v957_v22 }
 0x3d0   :  { %2644 = vmatmul.mubr.bf16.gmra.mrb[136].mxu0 %v1020_v24 }
 0x3d1   :  { %v964_v25 = vpop.f32.mrb[88].mxu1  ;;  %2647 = vmatprep.mubr.msk.bf16.mxu0 %vm2936_vm0, %v2935_v0 }
 0x3d2   :  { %v2581_v26 = vpop.f32.mrb[89].mxu1  ;;  %v965_v28 = vadd.f32 %v964_v25, %v3436_v21 }
 0x3d3   :  { %v967_v27 = vpop.f32.mrb[90].mxu1 }
 0x3d4   :  { %v968_v29 = vadd.f32 %v967_v27, %v3436_v21  ;;  %v2582_v30 = vpop.f32.mrb[91].mxu1 }
 0x3d6   :  { %v1021_v31 = vpack.c.bf16 %v968_v29, %v965_v28 }
 0x3d8   :  { %2648 = vmatmul.mubr.bf16.gmra.mrb[140].mxu0 %v1021_v31 }
 0x3d9   :  { %v972_v32 = vpop.f32.mrb[92].mxu1  ;;  %2651 = vmatprep.mubr.msk.bf16.mxu0 %vm2936_vm0, %v2935_v0 }
 0x3da   :  { %v2585_v33 = vpop.f32.mrb[93].mxu1  ;;  %v973_v35 = vadd.f32 %v972_v32, %v3436_v21 }
 0x3db   :  { %v975_v34 = vpop.f32.mrb[94].mxu1 }
 0x3dc   :  { %v976_v36 = vadd.f32 %v975_v34, %v3436_v21  ;;  %v2586_v37 = vpop.f32.mrb[95].mxu1 }
 0x3de   :  { %v1022_v38 = vpack.c.bf16 %v976_v36, %v973_v35 }
 0x3e0   :  { %2652 = vmatmul.mubr.bf16.gmra.mrb[144].mxu0 %v1022_v38 }
 0x3e1   :  { %v980_v39 = vpop.f32.mrb[96].mxu1  ;;  %2655 = vmatprep.mubr.msk.bf16.mxu0 %vm2936_vm0, %v2935_v0 }
 0x3e2   :  { %v2589_v40 = vpop.f32.mrb[97].mxu1  ;;  %v981_v42 = vadd.f32 %v980_v39, %v3436_v21 }
 0x3e3   :  { %v983_v41 = vpop.f32.mrb[98].mxu1 }
 0x3e4   :  { %v984_v43 = vadd.f32 %v983_v41, %v3436_v21  ;;  %v2590_v44 = vpop.f32.mrb[99].mxu1 }
 0x3e6   :  { %v1023_v45 = vpack.c.bf16 %v984_v43, %v981_v42 }
 0x3e8   :  { %2656 = vmatmul.mubr.bf16.gmra.mrb[148].mxu0 %v1023_v45 }
 0x3e9   :  { %v988_v46 = vpop.f32.mrb[100].mxu1  ;;  %2659 = vmatprep.mubr.msk.bf16.mxu0 %vm2936_vm0, %v2935_v0 }
 0x3ea   :  { %v2593_v47 = vpop.f32.mrb[101].mxu1  ;;  %v989_v49 = vadd.f32 %v988_v46, %v3436_v21 }
 0x3eb   :  { %v991_v48 = vpop.f32.mrb[102].mxu1 }
 0x3ec   :  { %v992_v50 = vadd.f32 %v991_v48, %v3436_v21  ;;  %v2594_v51 = vpop.f32.mrb[103].mxu1  ;;  %v2919_v21 = vld [vmem:[%s3831_s1 + $0x190] sm:$0xff]  }
 0x3ed   :  { %2736 = vmatpush3.bf16.msra.mxu0 %v2919_v21 }
 0x3ee   :  { %v1024_v52 = vpack.c.bf16 %v992_v50, %v989_v49  ;;  %2737 = vmatprep.subr.bf16.mxu0 %v2935_v0 }
 0x3f0   :  { %2660 = vmatmul.mubr.bf16.gmra.mrb[152].mxu0 %v1024_v52 }
 0x3f1   :  { %2747 = vmatprep.mubr.msk.bf16.mxu0 %vm2936_vm0, %v2935_v0  ;;  %2738 = vmatpush3.bf16.msra.mxu0 %v2920_v55 }
 0x3f2   :  { %2739 = vmatprep.subr.bf16.mxu0 %v2935_v0 }
 0x3f5   :  { %2740 = vmatpush3.bf16.msra.mxu0 %v2921_v56 }
 0x3f6   :  { %2741 = vmatprep.subr.bf16.mxu0 %v2935_v0 }
 0x3f9   :  { %2742 = vmatpush3.bf16.msra.mxu0 %v2922_v58 }
 0x3fa   :  { %2743 = vmatprep.subr.bf16.mxu0 %v2935_v0 }
 0x3fd   :  { %2744 = vmatpush3.bf16.msra.mxu0 %v2923_v60 }
 0x3fe   :  { %2745 = vmatprep.subr.bf16.mxu0 %v2935_v0 }
 0x401   :  { %2746 = vmatpush3.bf16.msra.mxu0 %v2924_v6 }
 0x463   :  { %v1111_v62 = vpop.f32.mrb[104].mxu0 }
 0x464   :  { %v1112_v63 = vadd.f32 %v1111_v62, %v3520_v59  ;;  %v2613_v2 = vpop.f32.mrb[105].mxu0 }
 0x465   :  { %v1114_v4 = vpop.f32.mrb[106].mxu0 }
 0x466   :  { %v1115_v3 = vadd.f32 %v1114_v4, %v3520_v59  ;;  %v2614_v5 = vpop.f32.mrb[107].mxu0  ;;  %v1214_v7 = vmax.f32 %v1112_v63, 0.0 }
 0x468   :  { %v1215_v8 = vmax.f32 %v1115_v3, 0.0 }
 0x46a   :  { %v1257_v10 = vpack.c.bf16 %v1215_v8, %v1214_v7 }
 0x46b   :  { %v1119_v9 = vpop.f32.mrb[108].mxu0 }
 0x46c   :  { %v1120_v11 = vadd.f32 %v1119_v9, %v3520_v59  ;;  %v2617_v12 = vpop.f32.mrb[109].mxu0  ;;  %2680 = vmatmul.mubr.bf16.vlgmr.msra.gmra.mrb[104].mxu1 %v1257_v10 }
 0x46d   :  { %v1122_v13 = vpop.f32.mrb[110].mxu0  ;;  %2683 = vmatprep.mubr.msk.bf16.mxu1 %vm2936_vm0, %v2935_v0 }
 0x46e   :  { %v1123_v15 = vadd.f32 %v1122_v13, %v3520_v59  ;;  %v2618_v14 = vpop.f32.mrb[111].mxu0  ;;  %v1216_v16 = vmax.f32 %v1120_v11, 0.0 }
 0x470   :  { %v1217_v17 = vmax.f32 %v1123_v15, 0.0 }
 0x472   :  { %v1258_v18 = vpack.c.bf16 %v1217_v17, %v1216_v16 }
 0x473   :  { %v1127_v19 = vpop.f32.mrb[112].mxu0 }
 0x474   :  { %v1128_v22 = vadd.f32 %v1127_v19, %v3520_v59  ;;  %v2621_v1 = vpop.f32.mrb[113].mxu0  ;;  %2684 = vmatmul.mubr.bf16.gmra.mrb[108].mxu1 %v1258_v18 }
 0x475   :  { %v1130_v23 = vpop.f32.mrb[114].mxu0  ;;  %2687 = vmatprep.mubr.msk.bf16.mxu1 %vm2936_vm0, %v2935_v0 }
 0x476   :  { %v1131_v24 = vadd.f32 %v1130_v23, %v3520_v59  ;;  %v2622_v25 = vpop.f32.mrb[115].mxu0  ;;  %v1218_v26 = vmax.f32 %v1128_v22, 0.0 }
 0x478   :  { %v1219_v27 = vmax.f32 %v1131_v24, 0.0 }
 0x47a   :  { %v1259_v28 = vpack.c.bf16 %v1219_v27, %v1218_v26 }
 0x47b   :  { %v1135_v29 = vpop.f32.mrb[116].mxu0 }
 0x47c   :  { %v1136_v30 = vadd.f32 %v1135_v29, %v3520_v59  ;;  %v2625_v31 = vpop.f32.mrb[117].mxu0  ;;  %2688 = vmatmul.mubr.bf16.gmra.mrb[112].mxu1 %v1259_v28 }
 0x47d   :  { %v1138_v32 = vpop.f32.mrb[118].mxu0  ;;  %2691 = vmatprep.mubr.msk.bf16.mxu1 %vm2936_vm0, %v2935_v0 }
 0x47e   :  { %v1139_v33 = vadd.f32 %v1138_v32, %v3520_v59  ;;  %v2626_v34 = vpop.f32.mrb[119].mxu0  ;;  %v1220_v35 = vmax.f32 %v1136_v30, 0.0 }
 0x480   :  { %v1221_v36 = vmax.f32 %v1139_v33, 0.0 }
 0x482   :  { %v1260_v37 = vpack.c.bf16 %v1221_v36, %v1220_v35 }
 0x483   :  { %v1143_v38 = vpop.f32.mrb[120].mxu0 }
 0x484   :  { %v1144_v39 = vadd.f32 %v1143_v38, %v3520_v59  ;;  %v2629_v40 = vpop.f32.mrb[121].mxu0  ;;  %2692 = vmatmul.mubr.bf16.gmra.mrb[116].mxu1 %v1260_v37 }
 0x485   :  { %v1146_v41 = vpop.f32.mrb[122].mxu0  ;;  %2695 = vmatprep.mubr.msk.bf16.mxu1 %vm2936_vm0, %v2935_v0 }
 0x486   :  { %v1147_v42 = vadd.f32 %v1146_v41, %v3520_v59  ;;  %v2630_v43 = vpop.f32.mrb[123].mxu0  ;;  %v1222_v44 = vmax.f32 %v1144_v39, 0.0 }
 0x488   :  { %v1223_v45 = vmax.f32 %v1147_v42, 0.0 }
 0x48a   :  { %v1261_v46 = vpack.c.bf16 %v1223_v45, %v1222_v44 }
 0x48b   :  { %v1151_v47 = vpop.f32.mrb[124].mxu0 }
 0x48c   :  { %v1152_v48 = vadd.f32 %v1151_v47, %v3520_v59  ;;  %v2633_v49 = vpop.f32.mrb[125].mxu0  ;;  %2696 = vmatmul.mubr.bf16.gmra.mrb[120].mxu1 %v1261_v46 }
 0x48d   :  { %v1154_v50 = vpop.f32.mrb[126].mxu0  ;;  %2699 = vmatprep.mubr.msk.bf16.mxu1 %vm2936_vm0, %v2935_v0 }
 0x48e   :  { %v1155_v51 = vadd.f32 %v1154_v50, %v3520_v59  ;;  %v2634_v52 = vpop.f32.mrb[127].mxu0  ;;  %v1224_v53 = vmax.f32 %v1152_v48, 0.0 }
 0x490   :  { %v1225_v54 = vmax.f32 %v1155_v51, 0.0 }
 0x492   :  { %v1262_v21 = vpack.c.bf16 %v1225_v54, %v1224_v53 }
 0x493   :  { %v1159_v55 = vpop.f32.mrb[128].mxu0 }
 0x494   :  { %v1160_v56 = vadd.f32 %v1159_v55, %v3520_v59  ;;  %v2637_v57 = vpop.f32.mrb[129].mxu0  ;;  %2700 = vmatmul.mubr.bf16.gmra.mrb[124].mxu1 %v1262_v21 }
 0x495   :  { %v1162_v58 = vpop.f32.mrb[130].mxu0  ;;  %2703 = vmatprep.mubr.msk.bf16.mxu1 %vm2936_vm0, %v2935_v0 }
 0x496   :  { %v1163_v60 = vadd.f32 %v1162_v58, %v3520_v59  ;;  %v2638_v62 = vpop.f32.mrb[131].mxu0  ;;  %v1226_v63 = vmax.f32 %v1160_v56, 0.0  ;;  %v2925_v58 = vld [vmem:[%s3831_s1 + $0x1c0] sm:$0xff]  }
 0x497   :  { %2800 = vmatpush3.bf16.msra.mxu1 %v2925_v58  ;;  %v2928_v62 = vld [vmem:[%s3831_s1 + $0x1d8] sm:$0xff]  }
 0x498   :  { %v1227_v2 = vmax.f32 %v1163_v60, 0.0  ;;  %v2926_v60 = vld [vmem:[%s3831_s1 + $0x1c8] sm:$0xff]   ;;  %2801 = vmatprep.subr.bf16.mxu1 %v2935_v0 }
 0x49a   :  { %v1263_v4 = vpack.c.bf16 %v1227_v2, %v1226_v63  ;;  %v2929_v63 = vld [vmem:[%s3831_s1 + $0x1e0] sm:$0xff]   ;;  %v1272_v2 = vsub.s32 5, %v3146_v61 }
 0x49b   :  { %v1167_v3 = vpop.f32.mrb[132].mxu0  ;;  %2802 = vmatpush3.bf16.msra.mxu1 %v2926_v60 }
 0x49c   :  { %v1168_v5 = vadd.f32 %v1167_v3, %v3520_v59  ;;  %v2641_v6 = vpop.f32.mrb[133].mxu0  ;;  %2704 = vmatmul.mubr.bf16.gmra.mrb[128].mxu1 %v1263_v4  ;;  %2803 = vmatprep.subr.bf16.mxu1 %v2935_v0  ;;  %v2930_v4 = vld [vmem:[%s3831_s1 + $0x1e8] sm:$0xff]   ;;  %v3607_v3 = vrot.slane %v3433_v20, %v1272_v2 }
 0x49d   :  { %v1170_v7 = vpop.f32.mrb[134].mxu0  ;;  %2707 = vmatprep.mubr.msk.bf16.mxu1 %vm2936_vm0, %v2935_v0 }
 0x49e   :  { %v1171_v8 = vadd.f32 %v1170_v7, %v3520_v59  ;;  %v2642_v10 = vpop.f32.mrb[135].mxu0  ;;  %v1228_v9 = vmax.f32 %v1168_v5, 0.0  ;;  %v2931_v5 = vld [vmem:[%s3831_s1 + $0x1f0] sm:$0xff]  }
 0x4a0   :  { %v1229_v11 = vmax.f32 %v1171_v8, 0.0 }
 0x4a2   :  { %v1264_v12 = vpack.c.bf16 %v1229_v11, %v1228_v9 }
 0x4a3   :  { %v1175_v13 = vpop.f32.mrb[136].mxu0 }
 0x4a4   :  { %v1176_v15 = vadd.f32 %v1175_v13, %v3520_v59  ;;  %v2645_v14 = vpop.f32.mrb[137].mxu0  ;;  %2708 = vmatmul.mubr.bf16.gmra.mrb[132].mxu1 %v1264_v12  ;;  %v2932_v12 = vld [vmem:[%s3831_s1 + $0x1f8] sm:$0xff]  }
 0x4a5   :  { %v1178_v16 = vpop.f32.mrb[138].mxu0  ;;  %2711 = vmatprep.mubr.msk.bf16.mxu1 %vm2936_vm0, %v2935_v0 }
 0x4a6   :  { %v1179_v17 = vadd.f32 %v1178_v16, %v3520_v59  ;;  %v2646_v18 = vpop.f32.mrb[139].mxu0  ;;  %v1230_v19 = vmax.f32 %v1176_v15, 0.0 }
 0x4a8   :  { %v1231_v22 = vmax.f32 %v1179_v17, 0.0 }
 0x4aa   :  { %v1265_v1 = vpack.c.bf16 %v1231_v22, %v1230_v19 }
 0x4ab   :  { %v1183_v23 = vpop.f32.mrb[140].mxu0 }
 0x4ac   :  { %v1184_v24 = vadd.f32 %v1183_v23, %v3520_v59  ;;  %v2649_v25 = vpop.f32.mrb[141].mxu0  ;;  %2712 = vmatmul.mubr.bf16.gmra.mrb[136].mxu1 %v1265_v1 }
 0x4ad   :  { %v1186_v26 = vpop.f32.mrb[142].mxu0  ;;  %2715 = vmatprep.mubr.msk.bf16.mxu1 %vm2936_vm0, %v2935_v0 }
 0x4ae   :  { %v1187_v27 = vadd.f32 %v1186_v26, %v3520_v59  ;;  %v2650_v28 = vpop.f32.mrb[143].mxu0  ;;  %v1232_v29 = vmax.f32 %v1184_v24, 0.0 }
 0x4b0   :  { %v1233_v30 = vmax.f32 %v1187_v27, 0.0 }
 0x4b2   :  { %v1266_v31 = vpack.c.bf16 %v1233_v30, %v1232_v29 }
 0x4b3   :  { %v1191_v32 = vpop.f32.mrb[144].mxu0 }
 0x4b4   :  { %v1192_v33 = vadd.f32 %v1191_v32, %v3520_v59  ;;  %v2653_v34 = vpop.f32.mrb[145].mxu0  ;;  %2716 = vmatmul.mubr.bf16.gmra.mrb[140].mxu1 %v1266_v31 }
 0x4b5   :  { %v1194_v35 = vpop.f32.mrb[146].mxu0  ;;  %2719 = vmatprep.mubr.msk.bf16.mxu1 %vm2936_vm0, %v2935_v0 }
 0x4b6   :  { %v1195_v36 = vadd.f32 %v1194_v35, %v3520_v59  ;;  %v2654_v37 = vpop.f32.mrb[147].mxu0  ;;  %v1234_v38 = vmax.f32 %v1192_v33, 0.0 }
 0x4b8   :  { %v1235_v39 = vmax.f32 %v1195_v36, 0.0 }
 0x4ba   :  { %v1267_v40 = vpack.c.bf16 %v1235_v39, %v1234_v38 }
 0x4bb   :  { %v1199_v41 = vpop.f32.mrb[148].mxu0 }
 0x4bc   :  { %v1200_v42 = vadd.f32 %v1199_v41, %v3520_v59  ;;  %v2657_v43 = vpop.f32.mrb[149].mxu0  ;;  %2720 = vmatmul.mubr.bf16.gmra.mrb[144].mxu1 %v1267_v40 }
 0x4bd   :  { %v1202_v44 = vpop.f32.mrb[150].mxu0  ;;  %2723 = vmatprep.mubr.msk.bf16.mxu1 %vm2936_vm0, %v2935_v0 }
 0x4be   :  { %v1203_v45 = vadd.f32 %v1202_v44, %v3520_v59  ;;  %v2658_v46 = vpop.f32.mrb[151].mxu0  ;;  %v1236_v47 = vmax.f32 %v1200_v42, 0.0 }
 0x4c0   :  { %v1237_v48 = vmax.f32 %v1203_v45, 0.0 }
 0x4c2   :  { %v1268_v49 = vpack.c.bf16 %v1237_v48, %v1236_v47 }
 0x4c3   :  { %v1207_v50 = vpop.f32.mrb[152].mxu0 }
 0x4c4   :  { %v1208_v51 = vadd.f32 %v1207_v50, %v3520_v59  ;;  %v2661_v52 = vpop.f32.mrb[153].mxu0  ;;  %2724 = vmatmul.mubr.bf16.gmra.mrb[148].mxu1 %v1268_v49 }
 0x4c5   :  { %v1210_v53 = vpop.f32.mrb[154].mxu0  ;;  %2727 = vmatprep.mubr.msk.bf16.mxu1 %vm2936_vm0, %v2935_v0 }
 0x4c6   :  { %v1211_v54 = vadd.f32 %v1210_v53, %v3520_v59  ;;  %v2662_v21 = vpop.f32.mrb[155].mxu0  ;;  %v1238_v55 = vmax.f32 %v1208_v51, 0.0  ;;  %v2927_v59 = vld [vmem:[%s3831_s1 + $0x1d0] sm:$0xff]  }
 0x4c7   :  { %2804 = vmatpush3.bf16.msra.mxu1 %v2927_v59 }
 0x4c8   :  { %v1239_v56 = vmax.f32 %v1211_v54, 0.0  ;;  %2805 = vmatprep.subr.bf16.mxu1 %v2935_v0 }
 0x4ca   :  { %v1269_v57 = vpack.c.bf16 %v1239_v56, %v1238_v55 }
 0x4cb   :  { %2806 = vmatpush3.bf16.msra.mxu1 %v2928_v62 }
 0x4cc   :  { %2728 = vmatmul.mubr.bf16.gmra.mrb[152].mxu1 %v1269_v57  ;;  %2807 = vmatprep.subr.bf16.mxu1 %v2935_v0 }
 0x4cd   :  { %2815 = vmatprep.mubr.msk.bf16.mxu1 %vm2936_vm0, %v2935_v0 }
 0x4cf   :  { %2808 = vmatpush3.bf16.msra.mxu1 %v2929_v63 }
 0x4d0   :  { %2809 = vmatprep.subr.bf16.mxu1 %v2935_v0 }
 0x4d3   :  { %2810 = vmatpush3.bf16.msra.mxu1 %v2930_v4 }
 0x4d4   :  { %2811 = vmatprep.subr.bf16.mxu1 %v2935_v0 }
 0x4d7   :  { %2812 = vmatpush3.bf16.msra.mxu1 %v2931_v5 }
 0x4d8   :  { %2813 = vmatprep.subr.bf16.mxu1 %v2935_v0 }
 0x4db   :  { %2814 = vmatpush3.bf16.msra.mxu1 %v2932_v12 }
 0x53f   :  { %v1356_v6 = vpop.f32.mrb[104].mxu1 }
 0x540   :  { %v1357_v7 = vadd.f32 %v1356_v6, %v3607_v3  ;;  %v2681_v8 = vpop.f32.mrb[105].mxu1 }
 0x541   :  { %v1359_v10 = vpop.f32.mrb[106].mxu1 }
 0x542   :  { %v1360_v9 = vadd.f32 %v1359_v10, %v3607_v3  ;;  %v2682_v11 = vpop.f32.mrb[107].mxu1  ;;  %v1459_v13 = vmax.f32 %v1357_v7, 0.0 }
 0x544   :  { %v1460_v15 = vmax.f32 %v1360_v9, 0.0 }
 0x546   :  { %v1502_v14 = vpack.c.bf16 %v1460_v15, %v1459_v13 }
 0x547   :  { %v1364_v16 = vpop.f32.mrb[108].mxu1 }
 0x548   :  { %v1365_v17 = vadd.f32 %v1364_v16, %v3607_v3  ;;  %v2685_v18 = vpop.f32.mrb[109].mxu1  ;;  %2748 = vmatmul.mubr.bf16.vlgmr.msra.gmra.mrb[156].mxu0 %v1502_v14 }
 0x549   :  { %v1367_v19 = vpop.f32.mrb[110].mxu1  ;;  %2751 = vmatprep.mubr.msk.bf16.mxu0 %vm2936_vm0, %v2935_v0 }
 0x54a   :  { %v1368_v22 = vadd.f32 %v1367_v19, %v3607_v3  ;;  %v2686_v1 = vpop.f32.mrb[111].mxu1  ;;  %v1461_v23 = vmax.f32 %v1365_v17, 0.0 }
 0x54c   :  { %v1462_v24 = vmax.f32 %v1368_v22, 0.0 }
 0x54e   :  { %v1503_v25 = vpack.c.bf16 %v1462_v24, %v1461_v23 }
 0x54f   :  { %v1372_v26 = vpop.f32.mrb[112].mxu1 }
 0x550   :  { %v1373_v27 = vadd.f32 %v1372_v26, %v3607_v3  ;;  %v2689_v28 = vpop.f32.mrb[113].mxu1  ;;  %2752 = vmatmul.mubr.bf16.gmra.mrb[160].mxu0 %v1503_v25 }
 0x551   :  { %v1375_v29 = vpop.f32.mrb[114].mxu1  ;;  %2755 = vmatprep.mubr.msk.bf16.mxu0 %vm2936_vm0, %v2935_v0 }
 0x552   :  { %v1376_v30 = vadd.f32 %v1375_v29, %v3607_v3  ;;  %v2690_v31 = vpop.f32.mrb[115].mxu1  ;;  %v1463_v32 = vmax.f32 %v1373_v27, 0.0 }
 0x554   :  { %v1464_v33 = vmax.f32 %v1376_v30, 0.0 }
 0x556   :  { %v1504_v34 = vpack.c.bf16 %v1464_v33, %v1463_v32 }
 0x557   :  { %v1380_v35 = vpop.f32.mrb[116].mxu1 }
 0x558   :  { %v1381_v36 = vadd.f32 %v1380_v35, %v3607_v3  ;;  %v2693_v37 = vpop.f32.mrb[117].mxu1  ;;  %2756 = vmatmul.mubr.bf16.gmra.mrb[164].mxu0 %v1504_v34 }
 0x559   :  { %v1383_v38 = vpop.f32.mrb[118].mxu1  ;;  %2759 = vmatprep.mubr.msk.bf16.mxu0 %vm2936_vm0, %v2935_v0 }
 0x55a   :  { %v1384_v39 = vadd.f32 %v1383_v38, %v3607_v3  ;;  %v2694_v40 = vpop.f32.mrb[119].mxu1  ;;  %v1465_v41 = vmax.f32 %v1381_v36, 0.0 }
 0x55c   :  { %v1466_v42 = vmax.f32 %v1384_v39, 0.0 }
 0x55e   :  { %v1505_v43 = vpack.c.bf16 %v1466_v42, %v1465_v41 }
 0x55f   :  { %v1388_v44 = vpop.f32.mrb[120].mxu1 }
 0x560   :  { %v1389_v45 = vadd.f32 %v1388_v44, %v3607_v3  ;;  %v2697_v46 = vpop.f32.mrb[121].mxu1  ;;  %2760 = vmatmul.mubr.bf16.gmra.mrb[168].mxu0 %v1505_v43 }
 0x561   :  { %v1391_v47 = vpop.f32.mrb[122].mxu1  ;;  %2763 = vmatprep.mubr.msk.bf16.mxu0 %vm2936_vm0, %v2935_v0 }
 0x562   :  { %v1392_v48 = vadd.f32 %v1391_v47, %v3607_v3  ;;  %v2698_v49 = vpop.f32.mrb[123].mxu1  ;;  %v1467_v50 = vmax.f32 %v1389_v45, 0.0 }
 0x564   :  { %v1468_v51 = vmax.f32 %v1392_v48, 0.0 }
 0x566   :  { %v1506_v52 = vpack.c.bf16 %v1468_v51, %v1467_v50 }
 0x567   :  { %v1396_v53 = vpop.f32.mrb[124].mxu1 }
 0x568   :  { %v1397_v54 = vadd.f32 %v1396_v53, %v3607_v3  ;;  %v2701_v21 = vpop.f32.mrb[125].mxu1  ;;  %2764 = vmatmul.mubr.bf16.gmra.mrb[172].mxu0 %v1506_v52 }
 0x569   :  { %v1399_v55 = vpop.f32.mrb[126].mxu1  ;;  %2767 = vmatprep.mubr.msk.bf16.mxu0 %vm2936_vm0, %v2935_v0 }
 0x56a   :  { %v1400_v56 = vadd.f32 %v1399_v55, %v3607_v3  ;;  %v2702_v57 = vpop.f32.mrb[127].mxu1  ;;  %v1469_v58 = vmax.f32 %v1397_v54, 0.0 }
 0x56c   :  { %v1470_v60 = vmax.f32 %v1400_v56, 0.0 }
 0x56e   :  { %v1507_v59 = vpack.c.bf16 %v1470_v60, %v1469_v58 }
 0x56f   :  { %v1404_v62 = vpop.f32.mrb[128].mxu1 }
 0x570   :  { %v1405_v63 = vadd.f32 %v1404_v62, %v3607_v3  ;;  %v2705_v2 = vpop.f32.mrb[129].mxu1  ;;  %2768 = vmatmul.mubr.bf16.gmra.mrb[176].mxu0 %v1507_v59 }
 0x571   :  { %v1407_v4 = vpop.f32.mrb[130].mxu1  ;;  %2771 = vmatprep.mubr.msk.bf16.mxu0 %vm2936_vm0, %v2935_v0 }
 0x572   :  { %v1408_v5 = vadd.f32 %v1407_v4, %v3607_v3  ;;  %v2706_v6 = vpop.f32.mrb[131].mxu1  ;;  %v1471_v7 = vmax.f32 %v1405_v63, 0.0  ;;  %v1517_v4 = vsub.s32 6, %v3146_v61 }
 0x574   :  { %v1472_v8 = vmax.f32 %v1408_v5, 0.0  ;;  %v3669_v5 = vrot.slane %v3433_v20, %v1517_v4 }
 0x576   :  { %v1508_v10 = vpack.c.bf16 %v1472_v8, %v1471_v7 }
 0x577   :  { %v1412_v9 = vpop.f32.mrb[132].mxu1 }
 0x578   :  { %v1413_v11 = vadd.f32 %v1412_v9, %v3607_v3  ;;  %v2709_v12 = vpop.f32.mrb[133].mxu1  ;;  %2772 = vmatmul.mubr.bf16.gmra.mrb[180].mxu0 %v1508_v10 }
 0x579   :  { %v1415_v13 = vpop.f32.mrb[134].mxu1  ;;  %2775 = vmatprep.mubr.msk.bf16.mxu0 %vm2936_vm0, %v2935_v0 }
 0x57a   :  { %v1416_v15 = vadd.f32 %v1415_v13, %v3607_v3  ;;  %v2710_v14 = vpop.f32.mrb[135].mxu1  ;;  %v1473_v16 = vmax.f32 %v1413_v11, 0.0 }
 0x57c   :  { %v1474_v17 = vmax.f32 %v1416_v15, 0.0 }
 0x57e   :  { %v1509_v18 = vpack.c.bf16 %v1474_v17, %v1473_v16 }
 0x57f   :  { %v1420_v19 = vpop.f32.mrb[136].mxu1 }
 0x580   :  { %v1421_v22 = vadd.f32 %v1420_v19, %v3607_v3  ;;  %v2713_v1 = vpop.f32.mrb[137].mxu1  ;;  %2776 = vmatmul.mubr.bf16.gmra.mrb[184].mxu0 %v1509_v18 }
 0x581   :  { %v1423_v23 = vpop.f32.mrb[138].mxu1  ;;  %2779 = vmatprep.mubr.msk.bf16.mxu0 %vm2936_vm0, %v2935_v0 }
 0x582   :  { %v1424_v24 = vadd.f32 %v1423_v23, %v3607_v3  ;;  %v2714_v25 = vpop.f32.mrb[139].mxu1  ;;  %v1475_v26 = vmax.f32 %v1421_v22, 0.0 }
 0x584   :  { %v1476_v27 = vmax.f32 %v1424_v24, 0.0 }
 0x586   :  { %v1510_v28 = vpack.c.bf16 %v1476_v27, %v1475_v26 }
 0x587   :  { %v1428_v29 = vpop.f32.mrb[140].mxu1 }
 0x588   :  { %v1429_v30 = vadd.f32 %v1428_v29, %v3607_v3  ;;  %v2717_v31 = vpop.f32.mrb[141].mxu1  ;;  %2780 = vmatmul.mubr.bf16.gmra.mrb[188].mxu0 %v1510_v28 }
 0x589   :  { %v1431_v32 = vpop.f32.mrb[142].mxu1  ;;  %2783 = vmatprep.mubr.msk.bf16.mxu0 %vm2936_vm0, %v2935_v0 }
 0x58a   :  { %v1432_v33 = vadd.f32 %v1431_v32, %v3607_v3  ;;  %v2718_v34 = vpop.f32.mrb[143].mxu1  ;;  %v1477_v35 = vmax.f32 %v1429_v30, 0.0 }
 0x58c   :  { %v1478_v36 = vmax.f32 %v1432_v33, 0.0 }
 0x58e   :  { %v1511_v37 = vpack.c.bf16 %v1478_v36, %v1477_v35 }
 0x58f   :  { %v1436_v38 = vpop.f32.mrb[144].mxu1 }
 0x590   :  { %v1437_v39 = vadd.f32 %v1436_v38, %v3607_v3  ;;  %v2721_v40 = vpop.f32.mrb[145].mxu1  ;;  %2784 = vmatmul.mubr.bf16.gmra.mrb[192].mxu0 %v1511_v37 }
 0x591   :  { %v1439_v41 = vpop.f32.mrb[146].mxu1  ;;  %2787 = vmatprep.mubr.msk.bf16.mxu0 %vm2936_vm0, %v2935_v0 }
 0x592   :  { %v1440_v42 = vadd.f32 %v1439_v41, %v3607_v3  ;;  %v2722_v43 = vpop.f32.mrb[147].mxu1  ;;  %v1479_v44 = vmax.f32 %v1437_v39, 0.0 }
 0x594   :  { %v1480_v45 = vmax.f32 %v1440_v42, 0.0 }
 0x596   :  { %v1512_v46 = vpack.c.bf16 %v1480_v45, %v1479_v44 }
 0x597   :  { %v1444_v47 = vpop.f32.mrb[148].mxu1 }
 0x598   :  { %v1445_v48 = vadd.f32 %v1444_v47, %v3607_v3  ;;  %v2725_v49 = vpop.f32.mrb[149].mxu1  ;;  %2788 = vmatmul.mubr.bf16.gmra.mrb[196].mxu0 %v1512_v46 }
 0x599   :  { %v1447_v50 = vpop.f32.mrb[150].mxu1  ;;  %2791 = vmatprep.mubr.msk.bf16.mxu0 %vm2936_vm0, %v2935_v0 }
 0x59a   :  { %v1448_v51 = vadd.f32 %v1447_v50, %v3607_v3  ;;  %v2726_v52 = vpop.f32.mrb[151].mxu1  ;;  %v1481_v53 = vmax.f32 %v1445_v48, 0.0 }
 0x59c   :  { %v1482_v54 = vmax.f32 %v1448_v51, 0.0 }
 0x59e   :  { %v1513_v21 = vpack.c.bf16 %v1482_v54, %v1481_v53 }
 0x59f   :  { %v1452_v55 = vpop.f32.mrb[152].mxu1 }
 0x5a0   :  { %v1453_v56 = vadd.f32 %v1452_v55, %v3607_v3  ;;  %v2729_v57 = vpop.f32.mrb[153].mxu1  ;;  %2792 = vmatmul.mubr.bf16.gmra.mrb[200].mxu0 %v1513_v21 }
 0x5a1   :  { %v1455_v58 = vpop.f32.mrb[154].mxu1  ;;  %2795 = vmatprep.mubr.msk.bf16.mxu0 %vm2936_vm0, %v2935_v0 }
 0x5a2   :  { %v1456_v60 = vadd.f32 %v1455_v58, %v3607_v3  ;;  %v2730_v59 = vpop.f32.mrb[155].mxu1  ;;  %v1483_v62 = vmax.f32 %v1453_v56, 0.0 }
 0x5a4   :  { %v1484_v63 = vmax.f32 %v1456_v60, 0.0 }
 0x5a6   :  { %v1514_v2 = vpack.c.bf16 %v1484_v63, %v1483_v62 }
 0x5a8   :  { %2796 = vmatmul.mubr.bf16.gmra.mrb[204].mxu0 %v1514_v2 }
 0x61b   :  { %v1601_v6 = vpop.f32.mrb[156].mxu0 }
 0x61c   :  { %v1602_v7 = vadd.f32 %v1601_v6, %v3669_v5  ;;  %v2749_v8 = vpop.f32.mrb[157].mxu0 }
 0x61d   :  { %v1604_v10 = vpop.f32.mrb[158].mxu0 }
 0x61e   :  { %v1605_v9 = vadd.f32 %v1604_v10, %v3669_v5  ;;  %v2750_v11 = vpop.f32.mrb[159].mxu0  ;;  %v1704_v12 = vmax.f32 %v1602_v7, 0.0 }
 0x620   :  { %v1705_v3 = vmax.f32 %v1605_v9, 0.0 }
 0x622   :  { %v1747_v13 = vpack.c.bf16 %v1705_v3, %v1704_v12 }
 0x623   :  { %v1609_v15 = vpop.f32.mrb[160].mxu0 }
 0x624   :  { %v1610_v14 = vadd.f32 %v1609_v15, %v3669_v5  ;;  %v2753_v16 = vpop.f32.mrb[161].mxu0  ;;  %2816 = vmatmul.mubr.bf16.vlgmr.msra.gmra.mrb[156].mxu1 %v1747_v13 }
 0x625   :  { %v1612_v17 = vpop.f32.mrb[162].mxu0  ;;  %2819 = vmatprep.mubr.msk.bf16.mxu1 %vm2936_vm0, %v2935_v0 }
 0x626   :  { %v1613_v20 = vadd.f32 %v1612_v17, %v3669_v5  ;;  %v2754_v18 = vpop.f32.mrb[163].mxu0  ;;  %v1706_v19 = vmax.f32 %v1610_v14, 0.0 }
 0x628   :  { %v1707_v22 = vmax.f32 %v1613_v20, 0.0 }
 0x62a   :  { %v1748_v1 = vpack.c.bf16 %v1707_v22, %v1706_v19 }
 0x62b   :  { %v1617_v23 = vpop.f32.mrb[164].mxu0 }
 0x62c   :  { %v1618_v24 = vadd.f32 %v1617_v23, %v3669_v5  ;;  %v2757_v25 = vpop.f32.mrb[165].mxu0  ;;  %2820 = vmatmul.mubr.bf16.gmra.mrb[160].mxu1 %v1748_v1 }
 0x62d   :  { %v1620_v26 = vpop.f32.mrb[166].mxu0  ;;  %2823 = vmatprep.mubr.msk.bf16.mxu1 %vm2936_vm0, %v2935_v0 }
 0x62e   :  { %v1621_v27 = vadd.f32 %v1620_v26, %v3669_v5  ;;  %v2758_v28 = vpop.f32.mrb[167].mxu0  ;;  %v1708_v29 = vmax.f32 %v1618_v24, 0.0 }
 0x630   :  { %v1709_v30 = vmax.f32 %v1621_v27, 0.0 }
 0x632   :  { %v1749_v31 = vpack.c.bf16 %v1709_v30, %v1708_v29 }
 0x633   :  { %v1625_v32 = vpop.f32.mrb[168].mxu0 }
 0x634   :  { %v1626_v33 = vadd.f32 %v1625_v32, %v3669_v5  ;;  %v2761_v34 = vpop.f32.mrb[169].mxu0  ;;  %2824 = vmatmul.mubr.bf16.gmra.mrb[164].mxu1 %v1749_v31 }
 0x635   :  { %v1628_v35 = vpop.f32.mrb[170].mxu0  ;;  %2827 = vmatprep.mubr.msk.bf16.mxu1 %vm2936_vm0, %v2935_v0 }
 0x636   :  { %v1629_v36 = vadd.f32 %v1628_v35, %v3669_v5  ;;  %v2762_v37 = vpop.f32.mrb[171].mxu0  ;;  %v1710_v38 = vmax.f32 %v1626_v33, 0.0 }
 0x638   :  { %v1711_v39 = vmax.f32 %v1629_v36, 0.0 }
 0x63a   :  { %v1750_v40 = vpack.c.bf16 %v1711_v39, %v1710_v38 }
 0x63b   :  { %v1633_v41 = vpop.f32.mrb[172].mxu0 }
 0x63c   :  { %v1634_v42 = vadd.f32 %v1633_v41, %v3669_v5  ;;  %v2765_v43 = vpop.f32.mrb[173].mxu0  ;;  %2828 = vmatmul.mubr.bf16.gmra.mrb[168].mxu1 %v1750_v40 }
 0x63d   :  { %v1636_v44 = vpop.f32.mrb[174].mxu0  ;;  %2831 = vmatprep.mubr.msk.bf16.mxu1 %vm2936_vm0, %v2935_v0 }
 0x63e   :  { %v1637_v45 = vadd.f32 %v1636_v44, %v3669_v5  ;;  %v2766_v46 = vpop.f32.mrb[175].mxu0  ;;  %v1712_v47 = vmax.f32 %v1634_v42, 0.0 }
 0x640   :  { %v1713_v48 = vmax.f32 %v1637_v45, 0.0 }
 0x642   :  { %v1751_v49 = vpack.c.bf16 %v1713_v48, %v1712_v47 }
 0x643   :  { %v1641_v50 = vpop.f32.mrb[176].mxu0 }
 0x644   :  { %v1642_v51 = vadd.f32 %v1641_v50, %v3669_v5  ;;  %v2769_v52 = vpop.f32.mrb[177].mxu0  ;;  %2832 = vmatmul.mubr.bf16.gmra.mrb[172].mxu1 %v1751_v49 }
 0x645   :  { %v1644_v53 = vpop.f32.mrb[178].mxu0  ;;  %2835 = vmatprep.mubr.msk.bf16.mxu1 %vm2936_vm0, %v2935_v0 }
 0x646   :  { %v1645_v54 = vadd.f32 %v1644_v53, %v3669_v5  ;;  %v2770_v21 = vpop.f32.mrb[179].mxu0  ;;  %v1714_v55 = vmax.f32 %v1642_v51, 0.0 }
 0x648   :  { %v1715_v56 = vmax.f32 %v1645_v54, 0.0 }
 0x64a   :  { %v1752_v57 = vpack.c.bf16 %v1715_v56, %v1714_v55 }
 0x64b   :  { %v1649_v58 = vpop.f32.mrb[180].mxu0 }
 0x64c   :  { %v1650_v60 = vadd.f32 %v1649_v58, %v3669_v5  ;;  %v2773_v59 = vpop.f32.mrb[181].mxu0  ;;  %2836 = vmatmul.mubr.bf16.gmra.mrb[176].mxu1 %v1752_v57 }
 0x64d   :  { %v1652_v62 = vpop.f32.mrb[182].mxu0  ;;  %2839 = vmatprep.mubr.msk.bf16.mxu1 %vm2936_vm0, %v2935_v0  ;;  %v1762_v59 = vsub.s32 7, %v3146_v61 }
 0x64e   :  { %v1653_v63 = vadd.f32 %v1652_v62, %v3669_v5  ;;  %v2774_v2 = vpop.f32.mrb[183].mxu0  ;;  %v1716_v4 = vmax.f32 %v1650_v60, 0.0  ;;  %v2934_v62 = vld [vmem:[%s3833_s2] sm:$0xff] }
 0x650   :  { %v1717_v6 = vmax.f32 %v1653_v63, 0.0  ;;  %v3725_v63 = vrot.slane %v2934_v62, %v1762_v59 }
 0x652   :  { %v1753_v7 = vpack.c.bf16 %v1717_v6, %v1716_v4 }
 0x653   :  { %v1657_v8 = vpop.f32.mrb[184].mxu0 }
 0x654   :  { %v1658_v10 = vadd.f32 %v1657_v8, %v3669_v5  ;;  %v2777_v9 = vpop.f32.mrb[185].mxu0  ;;  %2840 = vmatmul.mubr.bf16.gmra.mrb[180].mxu1 %v1753_v7 }
 0x655   :  { %v1660_v11 = vpop.f32.mrb[186].mxu0  ;;  %2843 = vmatprep.mubr.msk.bf16.mxu1 %vm2936_vm0, %v2935_v0 }
 0x656   :  { %v1661_v12 = vadd.f32 %v1660_v11, %v3669_v5  ;;  %v2778_v3 = vpop.f32.mrb[187].mxu0  ;;  %v1718_v13 = vmax.f32 %v1658_v10, 0.0 }
 0x658   :  { %v1719_v15 = vmax.f32 %v1661_v12, 0.0 }
 0x65a   :  { %v1754_v14 = vpack.c.bf16 %v1719_v15, %v1718_v13 }
 0x65b   :  { %v1665_v16 = vpop.f32.mrb[188].mxu0 }
 0x65c   :  { %v1666_v17 = vadd.f32 %v1665_v16, %v3669_v5  ;;  %v2781_v20 = vpop.f32.mrb[189].mxu0  ;;  %2844 = vmatmul.mubr.bf16.gmra.mrb[184].mxu1 %v1754_v14 }
 0x65d   :  { %v1668_v18 = vpop.f32.mrb[190].mxu0  ;;  %2847 = vmatprep.mubr.msk.bf16.mxu1 %vm2936_vm0, %v2935_v0 }
 0x65e   :  { %v1669_v19 = vadd.f32 %v1668_v18, %v3669_v5  ;;  %v2782_v22 = vpop.f32.mrb[191].mxu0  ;;  %v1720_v1 = vmax.f32 %v1666_v17, 0.0 }
 0x660   :  { %v1721_v23 = vmax.f32 %v1669_v19, 0.0 }
 0x662   :  { %v1755_v24 = vpack.c.bf16 %v1721_v23, %v1720_v1 }
 0x663   :  { %v1673_v25 = vpop.f32.mrb[192].mxu0 }
 0x664   :  { %v1674_v26 = vadd.f32 %v1673_v25, %v3669_v5  ;;  %v2785_v27 = vpop.f32.mrb[193].mxu0  ;;  %2848 = vmatmul.mubr.bf16.gmra.mrb[188].mxu1 %v1755_v24 }
 0x665   :  { %v1676_v28 = vpop.f32.mrb[194].mxu0  ;;  %2851 = vmatprep.mubr.msk.bf16.mxu1 %vm2936_vm0, %v2935_v0 }
 0x666   :  { %v1677_v29 = vadd.f32 %v1676_v28, %v3669_v5  ;;  %v2786_v30 = vpop.f32.mrb[195].mxu0  ;;  %v1722_v31 = vmax.f32 %v1674_v26, 0.0 }
 0x668   :  { %v1723_v32 = vmax.f32 %v1677_v29, 0.0 }
 0x66a   :  { %v1756_v33 = vpack.c.bf16 %v1723_v32, %v1722_v31 }
 0x66b   :  { %v1681_v34 = vpop.f32.mrb[196].mxu0 }
 0x66c   :  { %v1682_v35 = vadd.f32 %v1681_v34, %v3669_v5  ;;  %v2789_v36 = vpop.f32.mrb[197].mxu0  ;;  %2852 = vmatmul.mubr.bf16.gmra.mrb[192].mxu1 %v1756_v33 }
 0x66d   :  { %v1684_v37 = vpop.f32.mrb[198].mxu0  ;;  %2855 = vmatprep.mubr.msk.bf16.mxu1 %vm2936_vm0, %v2935_v0 }
 0x66e   :  { %v1685_v38 = vadd.f32 %v1684_v37, %v3669_v5  ;;  %v2790_v39 = vpop.f32.mrb[199].mxu0  ;;  %v1724_v40 = vmax.f32 %v1682_v35, 0.0 }
 0x670   :  { %v1725_v41 = vmax.f32 %v1685_v38, 0.0 }
 0x672   :  { %v1757_v42 = vpack.c.bf16 %v1725_v41, %v1724_v40 }
 0x673   :  { %v1689_v43 = vpop.f32.mrb[200].mxu0 }
 0x674   :  { %v1690_v44 = vadd.f32 %v1689_v43, %v3669_v5  ;;  %v2793_v45 = vpop.f32.mrb[201].mxu0  ;;  %2856 = vmatmul.mubr.bf16.gmra.mrb[196].mxu1 %v1757_v42 }
 0x675   :  { %v1692_v46 = vpop.f32.mrb[202].mxu0  ;;  %2859 = vmatprep.mubr.msk.bf16.mxu1 %vm2936_vm0, %v2935_v0 }
 0x676   :  { %v1693_v47 = vadd.f32 %v1692_v46, %v3669_v5  ;;  %v2794_v48 = vpop.f32.mrb[203].mxu0  ;;  %v1726_v49 = vmax.f32 %v1690_v44, 0.0 }
 0x678   :  { %v1727_v50 = vmax.f32 %v1693_v47, 0.0 }
 0x67a   :  { %v1758_v51 = vpack.c.bf16 %v1727_v50, %v1726_v49 }
 0x67b   :  { %v1697_v52 = vpop.f32.mrb[204].mxu0 }
 0x67c   :  { %v1698_v53 = vadd.f32 %v1697_v52, %v3669_v5  ;;  %v2797_v54 = vpop.f32.mrb[205].mxu0  ;;  %2860 = vmatmul.mubr.bf16.gmra.mrb[200].mxu1 %v1758_v51 }
 0x67d   :  { %v1700_v21 = vpop.f32.mrb[206].mxu0  ;;  %2863 = vmatprep.mubr.msk.bf16.mxu1 %vm2936_vm0, %v2935_v0 }
 0x67e   :  { %v1701_v55 = vadd.f32 %v1700_v21, %v3669_v5  ;;  %v2798_v56 = vpop.f32.mrb[207].mxu0  ;;  %v1728_v57 = vmax.f32 %v1698_v53, 0.0 }
 0x680   :  { %v1729_v58 = vmax.f32 %v1701_v55, 0.0 }
 0x682   :  { %v1759_v60 = vpack.c.bf16 %v1729_v58, %v1728_v57 }
 0x684   :  { %2864 = vmatmul.mubr.bf16.gmra.mrb[204].mxu1 %v1759_v60 }
 0x6f7   :  { %v1846_v2 = vpop.f32.mrb[156].mxu1 }
 0x6f8   :  { %v1847_v4 = vadd.f32 %v1846_v2, %v3725_v63  ;;  %v2817_v6 = vpop.f32.mrb[157].mxu1 }
 0x6f9   :  { %v1849_v0 = vpop.f32.mrb[158].mxu1 }
 0x6fa   :  { %1949 = vst [vmem:[%s3834_s3] sm:$0xff] %v1847_v4  ;;  %v1850_v5 = vadd.f32 %v1849_v0, %v3725_v63  ;;  %v2818_v7 = vpop.f32.mrb[159].mxu1 }
 0x6fc   :  { %1950 = vst [vmem:[%s3834_s3 + $0x8] sm:$0xff] %v1850_v5 }
 0x6ff   :  { %v1854_v61 = vpop.f32.mrb[160].mxu1 }
 0x700   :  { %v1855_v8 = vadd.f32 %v1854_v61, %v3725_v63  ;;  %v2821_v10 = vpop.f32.mrb[161].mxu1 }
 0x701   :  { %v1857_v9 = vpop.f32.mrb[162].mxu1 }
 0x702   :  { %1951 = vst [vmem:[%s3834_s3 + $0x10] sm:$0xff] %v1855_v8  ;;  %v1858_v11 = vadd.f32 %v1857_v9, %v3725_v63  ;;  %v2822_v12 = vpop.f32.mrb[163].mxu1 }
 0x704   :  { %1952 = vst [vmem:[%s3834_s3 + $0x18] sm:$0xff] %v1858_v11 }
 0x707   :  { %v1862_v3 = vpop.f32.mrb[164].mxu1 }
 0x708   :  { %v1863_v13 = vadd.f32 %v1862_v3, %v3725_v63  ;;  %v2825_v15 = vpop.f32.mrb[165].mxu1 }
 0x709   :  { %v1865_v14 = vpop.f32.mrb[166].mxu1 }
 0x70a   :  { %1953 = vst [vmem:[%s3834_s3 + $0x20] sm:$0xff] %v1863_v13  ;;  %v1866_v16 = vadd.f32 %v1865_v14, %v3725_v63  ;;  %v2826_v17 = vpop.f32.mrb[167].mxu1 }
 0x70c   :  { %1954 = vst [vmem:[%s3834_s3 + $0x28] sm:$0xff] %v1866_v16 }
 0x70f   :  { %v1870_v20 = vpop.f32.mrb[168].mxu1 }
 0x710   :  { %v1871_v18 = vadd.f32 %v1870_v20, %v3725_v63  ;;  %v2829_v19 = vpop.f32.mrb[169].mxu1 }
 0x711   :  { %v1873_v22 = vpop.f32.mrb[170].mxu1 }
 0x712   :  { %1955 = vst [vmem:[%s3834_s3 + $0x30] sm:$0xff] %v1871_v18  ;;  %v1874_v1 = vadd.f32 %v1873_v22, %v3725_v63  ;;  %v2830_v23 = vpop.f32.mrb[171].mxu1 }
 0x714   :  { %1956 = vst [vmem:[%s3834_s3 + $0x38] sm:$0xff] %v1874_v1 }
 0x717   :  { %v1878_v24 = vpop.f32.mrb[172].mxu1 }
 0x718   :  { %v1879_v25 = vadd.f32 %v1878_v24, %v3725_v63  ;;  %v2833_v26 = vpop.f32.mrb[173].mxu1 }
 0x719   :  { %v1881_v27 = vpop.f32.mrb[174].mxu1 }
 0x71a   :  { %1957 = vst [vmem:[%s3834_s3 + $0x40] sm:$0xff] %v1879_v25  ;;  %v1882_v28 = vadd.f32 %v1881_v27, %v3725_v63  ;;  %v2834_v29 = vpop.f32.mrb[175].mxu1 }
 0x71c   :  { %1958 = vst [vmem:[%s3834_s3 + $0x48] sm:$0xff] %v1882_v28 }
 0x71f   :  { %v1886_v30 = vpop.f32.mrb[176].mxu1 }
 0x720   :  { %v1887_v31 = vadd.f32 %v1886_v30, %v3725_v63  ;;  %v2837_v32 = vpop.f32.mrb[177].mxu1 }
 0x721   :  { %v1889_v33 = vpop.f32.mrb[178].mxu1 }
 0x722   :  { %1959 = vst [vmem:[%s3834_s3 + $0x50] sm:$0xff] %v1887_v31  ;;  %v1890_v34 = vadd.f32 %v1889_v33, %v3725_v63  ;;  %v2838_v35 = vpop.f32.mrb[179].mxu1 }
 0x724   :  { %1960 = vst [vmem:[%s3834_s3 + $0x58] sm:$0xff] %v1890_v34 }
 0x727   :  { %v1894_v36 = vpop.f32.mrb[180].mxu1 }
 0x728   :  { %v1895_v37 = vadd.f32 %v1894_v36, %v3725_v63  ;;  %v2841_v38 = vpop.f32.mrb[181].mxu1 }
 0x729   :  { %v1897_v39 = vpop.f32.mrb[182].mxu1 }
 0x72a   :  { %1961 = vst [vmem:[%s3834_s3 + $0x60] sm:$0xff] %v1895_v37  ;;  %v1898_v40 = vadd.f32 %v1897_v39, %v3725_v63  ;;  %v2842_v41 = vpop.f32.mrb[183].mxu1 }
 0x72c   :  { %1962 = vst [vmem:[%s3834_s3 + $0x68] sm:$0xff] %v1898_v40 }
 0x72f   :  { %v1902_v42 = vpop.f32.mrb[184].mxu1 }
 0x730   :  { %v1903_v43 = vadd.f32 %v1902_v42, %v3725_v63  ;;  %v2845_v44 = vpop.f32.mrb[185].mxu1 }
 0x731   :  { %v1905_v45 = vpop.f32.mrb[186].mxu1 }
 0x732   :  { %1963 = vst [vmem:[%s3834_s3 + $0x70] sm:$0xff] %v1903_v43  ;;  %v1906_v46 = vadd.f32 %v1905_v45, %v3725_v63  ;;  %v2846_v47 = vpop.f32.mrb[187].mxu1 }
 0x734   :  { %1964 = vst [vmem:[%s3834_s3 + $0x78] sm:$0xff] %v1906_v46 }
 0x737   :  { %v1910_v48 = vpop.f32.mrb[188].mxu1 }
 0x738   :  { %v1911_v49 = vadd.f32 %v1910_v48, %v3725_v63  ;;  %v2849_v50 = vpop.f32.mrb[189].mxu1 }
 0x739   :  { %v1913_v51 = vpop.f32.mrb[190].mxu1 }
 0x73a   :  { %1965 = vst [vmem:[%s3834_s3 + $0x80] sm:$0xff] %v1911_v49  ;;  %v1914_v52 = vadd.f32 %v1913_v51, %v3725_v63  ;;  %v2850_v53 = vpop.f32.mrb[191].mxu1 }
 0x73c   :  { %1966 = vst [vmem:[%s3834_s3 + $0x88] sm:$0xff] %v1914_v52 }
 0x73f   :  { %v1918_v54 = vpop.f32.mrb[192].mxu1 }
 0x740   :  { %v1919_v21 = vadd.f32 %v1918_v54, %v3725_v63  ;;  %v2853_v55 = vpop.f32.mrb[193].mxu1 }
 0x741   :  { %v1921_v56 = vpop.f32.mrb[194].mxu1 }
 0x742   :  { %1967 = vst [vmem:[%s3834_s3 + $0x90] sm:$0xff] %v1919_v21  ;;  %v1922_v57 = vadd.f32 %v1921_v56, %v3725_v63  ;;  %v2854_v58 = vpop.f32.mrb[195].mxu1 }
 0x744   :  { %1968 = vst [vmem:[%s3834_s3 + $0x98] sm:$0xff] %v1922_v57 }
 0x747   :  { %v1926_v60 = vpop.f32.mrb[196].mxu1 }
 0x748   :  { %v1927_v59 = vadd.f32 %v1926_v60, %v3725_v63  ;;  %v2857_v62 = vpop.f32.mrb[197].mxu1 }
 0x749   :  { %v1929_v2 = vpop.f32.mrb[198].mxu1 }
 0x74a   :  { %1969 = vst [vmem:[%s3834_s3 + $0xa0] sm:$0xff] %v1927_v59  ;;  %v1930_v4 = vadd.f32 %v1929_v2, %v3725_v63  ;;  %v2858_v6 = vpop.f32.mrb[199].mxu1 }
 0x74c   :  { %1970 = vst [vmem:[%s3834_s3 + $0xa8] sm:$0xff] %v1930_v4 }
 0x74f   :  { %v1934_v0 = vpop.f32.mrb[200].mxu1 }
 0x750   :  { %v1935_v5 = vadd.f32 %v1934_v0, %v3725_v63  ;;  %v2861_v7 = vpop.f32.mrb[201].mxu1 }
 0x751   :  { %v1937_v61 = vpop.f32.mrb[202].mxu1 }
 0x752   :  { %1971 = vst [vmem:[%s3834_s3 + $0xb0] sm:$0xff] %v1935_v5  ;;  %v1938_v8 = vadd.f32 %v1937_v61, %v3725_v63  ;;  %v2862_v10 = vpop.f32.mrb[203].mxu1 }
 0x754   :  { %1972 = vst [vmem:[%s3834_s3 + $0xb8] sm:$0xff] %v1938_v8 }
 0x757   :  { %v1942_v9 = vpop.f32.mrb[204].mxu1 }
 0x758   :  { %v1943_v11 = vadd.f32 %v1942_v9, %v3725_v63  ;;  %v2865_v12 = vpop.f32.mrb[205].mxu1 }
 0x759   :  { %v1945_v3 = vpop.f32.mrb[206].mxu1 }
 0x75a   :  { %1973 = vst [vmem:[%s3834_s3 + $0xc0] sm:$0xff] %v1943_v11  ;;  %v1946_v13 = vadd.f32 %v1945_v3, %v3725_v63  ;;  %v2866_v15 = vpop.f32.mrb[207].mxu1 }
 0x75c   :  { %1974 = vst [vmem:[%s3834_s3 + $0xc8] sm:$0xff] %v1946_v13 }

</bundles_post_ra>
